<compile_context>
chip_gen: v7x
topology: tpu7x:2x2x1
jax: 0.10.0
libtpu: 0.0.40
codegen_flags: <defaults>
</compile_context>

<pallas_src>
import numpy as np

import jax
import jax.numpy as jnp
from jax.experimental import pallas as pl
from jax.experimental.pallas import tpu as pltpu

NEG_SLOPE = 1.0          # nn.LeakyReLU(True) => negative_slope = float(True) = 1.0
BN_EPS = 1e-5
MXU_DTYPE = jnp.bfloat16  # matmul operand dtype (accumulation stays f32)

# conv configs: (kernel_size, dilation, padding)  -- all stride 1, "same" output
_CONV1 = (1, 1, 0)
_CONV2 = (3, 1, 1)
_CONV3 = (3, 2, 2)
_CONV4 = (2, 2, 1)


def _act(v):
    # LeakyReLU with slope 1.0 is the identity -> skip the compare+select.
    if NEG_SLOPE == 1.0:
        return v
    return jnp.where(v >= 0, v, NEG_SLOPE * v)


# ---------------------------------------------------------------------------
# Kernel
# ---------------------------------------------------------------------------
def _build_kernel(N, H, W):
    NH = N * H
    inv_count = 1.0 / float(N * H * W)

    def shift_rows(a2, rmod, s):
        """Rows of the (N*H, L) f32 slab shifted by s within each image, zero
        fill at image borders.  Implemented as an XLU sublane rotate plus a
        per-image boundary mask -- no slice+concatenate relayout copies.
        Rows that would wrap between images are exactly the masked rows."""
        if s == 0:
            return a2
        rolled = pltpu.roll(a2, shift=(-s) % NH, axis=0)   # rolled[g] = a2[g + s]
        ok = (rmod < (H - s)) if s > 0 else (rmod >= (-s))  # (NH, 1) bool
        return jnp.where(ok, rolled, 0.0)

    def conv_band(a2, rmod, wstack_ref, bl_ref, cfg):
        """Stride-1 'same' conv as ONE deep MXU contraction: lane-concat the
        Kh row-shifted slabs -> (N*H, Kh*W*Cin) and contract against the
        pre-stacked (Kh*W*Cin, W*Cout) band weight (kx taps, x zero padding
        and the Cin contraction are all folded into the band)."""
        K, dil, pad = cfg
        shifted = [shift_rows(a2, rmod, dil * ky - pad) for ky in range(K)]
        big = shifted[0] if K == 1 else jnp.concatenate(shifted, axis=-1)
        return jnp.dot(big.astype(MXU_DTYPE), wstack_ref[...],
                       preferred_element_type=jnp.float32) + bl_ref[...]

    def bn(y, g_ref, b_ref, sel_ref, selt_ref):
        """Training-mode BatchNorm2d on a lane-dense (N*H, W*Cout) slab.

        Single pass: per-channel sum / sum-of-squares reduced over rows (XLU)
        then over the W lane-groups with ONE stacked selector matmul; the
        scale/shift lane broadcast is ONE stacked sel^T matmul.  Biased
        variance, eps=1e-5, all in f32."""
        rsum = jnp.sum(y, axis=0, keepdims=True)                 # (1, W*Cout)
        rsq = jnp.sum(y * y, axis=0, keepdims=True)              # (1, W*Cout)
        stats = jnp.concatenate([rsum, rsq], axis=0)             # (2, W*Cout)
        stats_c = jnp.dot(stats, sel_ref[...],
                          preferred_element_type=jnp.float32) * inv_count  # (2, Cout)
        mean_c = stats_c[0:1, :]
        var_c = stats_c[1:2, :] - mean_c * mean_c                # biased variance
        scale_c = g_ref[...] * jax.lax.rsqrt(var_c + BN_EPS)     # (1, Cout)
        shift_c = b_ref[...] - mean_c * scale_c                  # (1, Cout)
        ss = jnp.concatenate([scale_c, shift_c], axis=0)         # (2, Cout)
        ss_l = jnp.dot(ss, selt_ref[...],
                       preferred_element_type=jnp.float32)       # (2, W*Cout)
        return y * ss_l[0:1, :] + ss_l[1:2, :]

    def kernel(x_ref,
               w1b_ref, b1l_ref, w2s_ref, b2l_ref, w3s_ref, b3l_ref,
               w4s_ref, b4l_ref, w5b_ref, b5l_ref,
               g1_ref, be1_ref, g2_ref, be2_ref,
               g3_ref, be3_ref, g4_ref, be4_ref,
               sel_ref, selt_ref, out_ref):
        x = x_ref[...]                                           # (N*H, W*Cin) f32
        # row index within each image, hoisted once and reused by every shift
        rmod = jax.lax.broadcasted_iota(jnp.int32, (NH, 1), 0) % H

        # shortcut = act1(conv1(x))   -- 1x1 conv == block-diagonal band matmul
        shortcut = _act(jnp.dot(x.astype(MXU_DTYPE), w1b_ref[...],
                                preferred_element_type=jnp.float32) + b1l_ref[...])

        # cat1 = bn1(act2(conv2(x)))          3x3, pad=1, dil=1  (K depth 192)
        cat1 = bn(_act(conv_band(x, rmod, w2s_ref, b2l_ref, _CONV2)),
                  g1_ref, be1_ref, sel_ref, selt_ref)

        # cat2 = bn2(act3(conv3(cat1)))       3x3, pad=2, dil=2  (K depth 384)
        cat2 = bn(_act(conv_band(cat1, rmod, w3s_ref, b3l_ref, _CONV3)),
                  g2_ref, be2_ref, sel_ref, selt_ref)

        # cat3 = bn3(act4(conv4(cat2)))       2x2, pad=1, dil=2  (K depth 256)
        cat3 = bn(_act(conv_band(cat2, rmod, w4s_ref, b4l_ref, _CONV4)),
                  g3_ref, be3_ref, sel_ref, selt_ref)

        # cat = bn4(act5(conv5(concat([cat1, cat2, cat3], channels))))
        # single fused dot over the 3*W*Cout lane concat (contraction depth 384)
        cc = jnp.concatenate([cat1, cat2, cat3], axis=-1).astype(MXU_DTYPE)
        z = jnp.dot(cc, w5b_ref[...], preferred_element_type=jnp.float32) + b5l_ref[...]
        cat = bn(_act(z), g4_ref, be4_ref, sel_ref, selt_ref)

        out_ref[...] = shortcut + cat                            # lane-dense full vst

    return kernel


# ---------------------------------------------------------------------------
# Wrapper-side weight packing (done once per model, outside the kernel)
# ---------------------------------------------------------------------------
def _tap_selector(K, dil, pad, W):
    s = np.zeros((K, W, W), np.float32)
    for kx in range(K):
        for x in range(W):
            xp = x + dil * kx - pad
            if 0 <= xp < W:
                s[kx, xp, x] = 1.0
    return s


def _band_weights(w_hwio, cfg, W):
    """(K, K, Cin, Cout) HWIO conv weight -> (Kh, W*Cin, W*Cout) per-ky band
    matrices fusing the kx taps, the x zero-padding, and the Cin contraction."""
    _, dil, pad = cfg
    Kh, Kw, Cin, Cout = w_hwio.shape
    sel = jnp.asarray(_tap_selector(Kw, dil, pad, W))            # (Kw, W, W)
    band = jnp.einsum("kpx,ykio->ypixo", sel, w_hwio)            # (Ky, W, Cin, W, Cout)
    return band.reshape(Kh, W * Cin, W * Cout)


def _stacked_band(w_hwio, cfg, W):
    """Stack the Kh band matrices along the contraction dim so the whole conv
    becomes one deep matmul against the lane-concat of shifted slabs."""
    band = _band_weights(w_hwio, cfg, W)                         # (Kh, W*Cin, W*Cout)
    Kh, KC, OC = band.shape
    return band.reshape(Kh * KC, OC)                             # (Kh*W*Cin, W*Cout)


def pack_params(p, W):
    """Pre-pack conv weights as lane-dense (stacked) band matrices (bf16) and
    biases / BN params as lane-tiled / per-channel f32 vectors."""
    Cout = p["w1"].shape[1]

    def tile_bias(b):
        return jnp.tile(b.reshape(1, Cout).astype(jnp.float32), (1, W))

    w1b = _band_weights(p["w1"].reshape(1, 1, -1, Cout), _CONV1, W)[0]   # (W*Cin, W*Cout)
    w2s = _stacked_band(p["w2"], _CONV2, W)                              # (3*W*Cin, W*Cout)
    w3s = _stacked_band(p["w3"], _CONV3, W)                              # (3*W*Cout, W*Cout)
    w4s = _stacked_band(p["w4"], _CONV4, W)                              # (2*W*Cout, W*Cout)
    w5b = jnp.concatenate(
        [_band_weights(p["w5"][g * Cout:(g + 1) * Cout].reshape(1, 1, Cout, Cout),
                       _CONV1, W)[0] for g in range(3)],
        axis=0)                                                          # (3*W*Cout, W*Cout)

    sel = jnp.asarray(np.tile(np.eye(Cout, dtype=np.float32), (W, 1)))   # (W*Cout, Cout)

    packed = {
        "w1b": w1b.astype(MXU_DTYPE), "b1l": tile_bias(p["b1"]),
        "w2s": w2s.astype(MXU_DTYPE), "b2l": tile_bias(p["b2"]),
        "w3s": w3s.astype(MXU_DTYPE), "b3l": tile_bias(p["b3"]),
        "w4s": w4s.astype(MXU_DTYPE), "b4l": tile_bias(p["b4"]),
        "w5b": w5b.astype(MXU_DTYPE), "b5l": tile_bias(p["b5"]),
        "sel": sel, "selt": sel.T,
    }
    for name in ("1", "2", "3", "4"):
        packed["g" + name] = p["g" + name].reshape(1, Cout).astype(jnp.float32)
        packed["be" + name] = p["be" + name].reshape(1, Cout).astype(jnp.float32)
    return packed


def _vmem_budget(args, out_shape):
    """Honest padded VMEM footprint (inputs + output) plus headroom for the
    live f32 intermediates (concats materialize).  No artificial 16 MiB floor:
    the real footprint at demo size is ~1 MiB, so the budget lands ~2-3 MiB.
    Re-derive against 64 MiB (not 128 MiB) when sizing tiles for v7x."""
    def padded_bytes(shape, dtype):
        shape = tuple(int(d) for d in shape)
        if len(shape) < 2:
            shape = (1,) * (2 - len(shape)) + shape
        rows = -(-shape[-2] // 8) * 8
        lanes = -(-shape[-1] // 128) * 128
        lead = 1
        for d in shape[:-2]:
            lead *= d
        return lead * rows * lanes * np.dtype(dtype).itemsize

    io_bytes = sum(padded_bytes(a.shape, a.dtype) for a in args)
    io_bytes += padded_bytes(out_shape, jnp.float32)
    tile = padded_bytes(out_shape, jnp.float32)          # one (N*H, W*Cout) f32 slab
    est = 2 * io_bytes + 96 * tile                       # generous bound on live temps
    return int(max(est, 2 * 1024 * 1024))


def block1res_forward(x_nchw, packed):
    """PyTorch-layout NCHW in / NCHW out; compute runs in one Pallas kernel
    operating on lane-dense (N*H, W*C) slabs."""
    N, Cin, H, W = x_nchw.shape
    Cout = packed["sel"].shape[1]

    # NCHW -> lane-dense (N*H, W*Cin) slab (f32; cast to bf16 happens at the
    # MXU operand inside the kernel).  In production keep the surrounding
    # model in NHWC / slab layout so this extra HBM pass disappears.
    x_slab = (jnp.transpose(x_nchw, (0, 2, 3, 1))
              .reshape(N * H, W * Cin).astype(jnp.float32))

    args = (x_slab,
            packed["w1b"], packed["b1l"], packed["w2s"], packed["b2l"],
            packed["w3s"], packed["b3l"], packed["w4s"], packed["b4l"],
            packed["w5b"], packed["b5l"],
            packed["g1"], packed["be1"], packed["g2"], packed["be2"],
            packed["g3"], packed["be3"], packed["g4"], packed["be4"],
            packed["sel"], packed["selt"])

    out_shape = (N * H, W * Cout)
    kernel = _build_kernel(N, H, W)
    out = pl.pallas_call(
        kernel,
        out_shape=jax.ShapeDtypeStruct(out_shape, jnp.float32),
        in_specs=[pl.BlockSpec(memory_space=pltpu.MemorySpace.VMEM)] * len(args),
        out_specs=pl.BlockSpec(memory_space=pltpu.MemorySpace.VMEM),
        compiler_params=pltpu.CompilerParams(
            vmem_limit_bytes=_vmem_budget(args, out_shape)),
    )(*args)

    # lane-dense slab -> NHWC -> NCHW (PyTorch layout)
    return jnp.transpose(out.reshape(N, H, W, Cout), (0, 3, 1, 2))


# ---------------------------------------------------------------------------
# Params + pure-JAX reference
# ---------------------------------------------------------------------------
def init_params(key, cin, cout):
    ks = jax.random.split(key, 24)
    n = lambda k, shp, s: (jax.random.normal(k, shp, jnp.float32) * s)
    p = {
        "w1": n(ks[0], (cin, cout), 0.30),
        "b1": n(ks[1], (1, cout), 0.10),
        "w2": n(ks[2], (3, 3, cin, cout), 0.20),   # HWIO
        "b2": n(ks[3], (1, cout), 0.10),
        "w3": n(ks[4], (3, 3, cout, cout), 0.15),
        "b3": n(ks[5], (1, cout), 0.10),
        "w4": n(ks[6], (2, 2, cout, cout), 0.20),
        "b4": n(ks[7], (1, cout), 0.10),
        "w5": n(ks[8], (3 * cout, cout), 0.15),    # (Cin_concat, Cout) of the 1x1 conv
        "b5": n(ks[9], (1, cout), 0.10),
    }
    for i, name in enumerate(["1", "2", "3", "4"]):
        p["g" + name] = 1.0 + n(ks[10 + 2 * i], (1, cout), 0.10)
        p["be" + name] = n(ks[11 + 2 * i], (1, cout), 0.10)
    return p


def reference_forward(x_nchw, p):
    """Pure-JAX (lax.conv, all f32) reference matching the PyTorch forward."""
    x = jnp.transpose(x_nchw, (0, 2, 3, 1)).astype(jnp.float32)
    cout = p["w1"].shape[1]

    def conv(xx, w, b, pad, dil):
        y = jax.lax.conv_general_dilated(
            xx, w, (1, 1), [(pad, pad), (pad, pad)], rhs_dilation=(dil, dil),
            dimension_numbers=("NHWC", "HWIO", "NHWC"))
        return y + b.reshape(1, 1, 1, -1)

    def bn(y, g, b):
        m = jnp.mean(y, axis=(0, 1, 2), keepdims=True)
        v = jnp.mean((y - m) ** 2, axis=(0, 1, 2), keepdims=True)
        return (y - m) / jnp.sqrt(v + BN_EPS) * g.reshape(1, 1, 1, -1) + b.reshape(1, 1, 1, -1)

    leaky = lambda v: jnp.where(v >= 0, v, NEG_SLOPE * v)
    shortcut = leaky(conv(x, p["w1"].reshape(1, 1, -1, cout), p["b1"], 0, 1))
    cat1 = bn(leaky(conv(x, p["w2"], p["b2"], 1, 1)), p["g1"], p["be1"])
    cat2 = bn(leaky(conv(cat1, p["w3"], p["b3"], 2, 2)), p["g2"], p["be2"])
    cat3 = bn(leaky(conv(cat2, p["w4"], p["b4"], 1, 2)), p["g3"], p["be3"])
    cat = jnp.concatenate([cat1, cat2, cat3], axis=-1)
    cat = bn(leaky(conv(cat, p["w5"].reshape(1, 1, 3 * cout, cout), p["b5"], 0, 1)),
             p["g4"], p["be4"])
    out = shortcut + cat
    return jnp.transpose(out, (0, 3, 1, 2))


if __name__ == "__main__":
    key = jax.random.PRNGKey(0)
    kx, kp = jax.random.split(key)

    in_channels, out_channels = 4, 8
    N, H, W = 2, 16, 16
    x = jax.random.normal(kx, (N, in_channels, H, W), jnp.float32)   # NCHW like PyTorch
    params = init_params(kp, in_channels, out_channels)
    packed = pack_params(params, W)

    out = jax.block_until_ready(block1res_forward(x, packed))
    assert out.shape == (N, out_channels, H, W), out.shape

    ref = jax.block_until_ready(reference_forward(x, params))
    max_err = float(jnp.max(jnp.abs(out - ref)))
    # bf16 matmul operands (f32 accumulation) vs an all-f32 reference.
    assert max_err < 1e-1, f"mismatch vs reference: max_err={max_err}"

    print("KERNEL_OK")
</pallas_src>

<mosaic_0001>
module attributes {stable_mosaic.version = 11 : i64} {
  func.func @kernel(%arg0: memref<32x64xf32, #tpu.memory_space<vmem>>, %arg1: memref<64x128xbf16, #tpu.memory_space<vmem>>, %arg2: memref<1x128xf32, #tpu.memory_space<vmem>>, %arg3: memref<192x128xbf16, #tpu.memory_space<vmem>>, %arg4: memref<1x128xf32, #tpu.memory_space<vmem>>, %arg5: memref<384x128xbf16, #tpu.memory_space<vmem>>, %arg6: memref<1x128xf32, #tpu.memory_space<vmem>>, %arg7: memref<256x128xbf16, #tpu.memory_space<vmem>>, %arg8: memref<1x128xf32, #tpu.memory_space<vmem>>, %arg9: memref<384x128xbf16, #tpu.memory_space<vmem>>, %arg10: memref<1x128xf32, #tpu.memory_space<vmem>>, %arg11: memref<1x8xf32, #tpu.memory_space<vmem>>, %arg12: memref<1x8xf32, #tpu.memory_space<vmem>>, %arg13: memref<1x8xf32, #tpu.memory_space<vmem>>, %arg14: memref<1x8xf32, #tpu.memory_space<vmem>>, %arg15: memref<1x8xf32, #tpu.memory_space<vmem>>, %arg16: memref<1x8xf32, #tpu.memory_space<vmem>>, %arg17: memref<1x8xf32, #tpu.memory_space<vmem>>, %arg18: memref<1x8xf32, #tpu.memory_space<vmem>>, %arg19: memref<128x8xf32, #tpu.memory_space<vmem>>, %arg20: memref<8x128xf32, #tpu.memory_space<vmem>>, %arg21: memref<32x128xf32, #tpu.memory_space<vmem>>) attributes {dimension_semantics = [], scalar_prefetch = 0 : i64, scratch_operands = 0 : i64, tpu.core_type = #tpu.core_type<tc>} {
    %c0 = arith.constant 0 : index
    %c0_0 = arith.constant 0 : index
    %0 = vector.load %arg0[%c0, %c0_0] : memref<32x64xf32, #tpu.memory_space<vmem>>, vector<32x64xf32>
    %1 = tpu.iota {dimensions = array<i32: 0>} : vector<32x1xi32>
    %c16_i32 = arith.constant 16 : i32
    %c0_i32 = arith.constant 0 : i32
    %2 = arith.cmpi eq, %c16_i32, %c0_i32 : i32
    %c1_i32 = arith.constant 1 : i32
    %3 = arith.select %2, %c1_i32, %c16_i32 : i32
    %4 = vector.broadcast %3 : i32 to vector<32x1xi32>
    %5 = arith.remsi %1, %4 : vector<32x1xi32>
    %c0_i32_1 = arith.constant 0 : i32
    %6 = vector.broadcast %c0_i32_1 : i32 to vector<32x1xi32>
    %7 = arith.cmpi ne, %5, %6 : vector<32x1xi32>
    %c0_i32_2 = arith.constant 0 : i32
    %8 = vector.broadcast %c0_i32_2 : i32 to vector<32x1xi32>
    %9 = arith.cmpi slt, %5, %8 : vector<32x1xi32>
    %c0_i32_3 = arith.constant 0 : i32
    %10 = arith.cmpi slt, %3, %c0_i32_3 : i32
    %11 = vector.broadcast %10 : i1 to vector<32x1xi1>
    %12 = vector.broadcast %11 : vector<32x1xi1> to vector<32x1xi1>
    %13 = arith.xori %9, %12 : vector<32x1xi1>
    %14 = arith.andi %13, %7 : vector<32x1xi1>
    %15 = vector.broadcast %3 : i32 to vector<32x1xi32>
    %16 = arith.addi %5, %15 : vector<32x1xi32>
    %17 = arith.select %14, %16, %5 : vector<32x1xi1>, vector<32x1xi32>
    %18 = arith.truncf %0 : vector<32x64xf32> to vector<32x64xbf16>
    %c0_4 = arith.constant 0 : index
    %c0_5 = arith.constant 0 : index
    %19 = vector.load %arg1[%c0_4, %c0_5] : memref<64x128xbf16, #tpu.memory_space<vmem>>, vector<64x128xbf16>
    %cst = arith.constant dense<0.000000e+00> : vector<32x128xf32>
    %20 = tpu.matmul %18, %19, %cst {dimension_numbers = #tpu.dot_dimension_numbers<[1], [0], [0], [1], [0, 0, 1, 1], [], []>} : vector<32x64xbf16>, vector<64x128xbf16>, vector<32x128xf32> -> vector<32x128xf32>
    %c0_6 = arith.constant 0 : index
    %c0_7 = arith.constant 0 : index
    %21 = vector.load %arg2[%c0_6, %c0_7] : memref<1x128xf32, #tpu.memory_space<vmem>>, vector<1x128xf32>
    %22 = vector.broadcast %21 : vector<1x128xf32> to vector<32x128xf32>
    %23 = arith.addf %20, %22 : vector<32x128xf32>
    %c1_i32_8 = arith.constant 1 : i32
    %24 = tpu.dynamic_rotate %0 by %c1_i32_8 dim 0 : vector<32x64xf32>, i32 -> vector<32x64xf32>
    %c1_i32_9 = arith.constant 1 : i32
    %25 = vector.broadcast %c1_i32_9 : i32 to vector<32x1xi32>
    %26 = arith.cmpi sge, %17, %25 : vector<32x1xi32>
    %cst_10 = arith.constant 0.000000e+00 : f32
    %27 = vector.shape_cast %26 : vector<32x1xi1> to vector<32x1xi1>
    %28 = vector.broadcast %27 : vector<32x1xi1> to vector<32x64xi1>
    %29 = vector.broadcast %cst_10 : f32 to vector<32x64xf32>
    %30 = arith.select %28, %24, %29 : vector<32x64xi1>, vector<32x64xf32>
    %c31_i32 = arith.constant 31 : i32
    %31 = tpu.dynamic_rotate %0 by %c31_i32 dim 0 : vector<32x64xf32>, i32 -> vector<32x64xf32>
    %c15_i32 = arith.constant 15 : i32
    %32 = vector.broadcast %c15_i32 : i32 to vector<32x1xi32>
    %33 = arith.cmpi slt, %17, %32 : vector<32x1xi32>
    %cst_11 = arith.constant 0.000000e+00 : f32
    %34 = vector.shape_cast %33 : vector<32x1xi1> to vector<32x1xi1>
    %35 = vector.broadcast %34 : vector<32x1xi1> to vector<32x64xi1>
    %36 = vector.broadcast %cst_11 : f32 to vector<32x64xf32>
    %37 = arith.select %35, %31, %36 : vector<32x64xi1>, vector<32x64xf32>
    %38 = tpu.concatenate %30, %0, %37 in 1 : vector<32x64xf32>, vector<32x64xf32>, vector<32x64xf32> -> vector<32x192xf32>
    %39 = arith.truncf %38 : vector<32x192xf32> to vector<32x192xbf16>
    %c0_12 = arith.constant 0 : index
    %c0_13 = arith.constant 0 : index
    %40 = vector.load %arg3[%c0_12, %c0_13] : memref<192x128xbf16, #tpu.memory_space<vmem>>, vector<192x128xbf16>
    %cst_14 = arith.constant dense<0.000000e+00> : vector<32x128xf32>
    %41 = tpu.matmul %39, %40, %cst_14 {dimension_numbers = #tpu.dot_dimension_numbers<[1], [0], [0], [1], [0, 0, 1, 1], [], []>} : vector<32x192xbf16>, vector<192x128xbf16>, vector<32x128xf32> -> vector<32x128xf32>
    %c0_15 = arith.constant 0 : index
    %c0_16 = arith.constant 0 : index
    %42 = vector.load %arg4[%c0_15, %c0_16] : memref<1x128xf32, #tpu.memory_space<vmem>>, vector<1x128xf32>
    %43 = vector.broadcast %42 : vector<1x128xf32> to vector<32x128xf32>
    %44 = arith.addf %41, %43 : vector<32x128xf32>
    %cst_17 = arith.constant dense<0.000000e+00> : vector<128xf32>
    %45 = vector.multi_reduction <add>, %44, %cst_17 [0] : vector<32x128xf32> to vector<128xf32>
    %46 = vector.shape_cast %45 : vector<128xf32> to vector<1x128xf32>
    %47 = arith.mulf %44, %44 : vector<32x128xf32>
    %cst_18 = arith.constant dense<0.000000e+00> : vector<128xf32>
    %48 = vector.multi_reduction <add>, %47, %cst_18 [0] : vector<32x128xf32> to vector<128xf32>
    %49 = vector.shape_cast %48 : vector<128xf32> to vector<1x128xf32>
    %50 = tpu.concatenate %46, %49 in 0 : vector<1x128xf32>, vector<1x128xf32> -> vector<2x128xf32>
    %c0_19 = arith.constant 0 : index
    %c0_20 = arith.constant 0 : index
    %51 = vector.load %arg19[%c0_19, %c0_20] : memref<128x8xf32, #tpu.memory_space<vmem>>, vector<128x8xf32>
    %cst_21 = arith.constant dense<0.000000e+00> : vector<2x8xf32>
    %52 = tpu.matmul %50, %51, %cst_21 {dimension_numbers = #tpu.dot_dimension_numbers<[1], [0], [0], [1], [0, 0, 1, 1], [], []>} : vector<2x128xf32>, vector<128x8xf32>, vector<2x8xf32> -> vector<2x8xf32>
    %cst_22 = arith.constant 0.001953125 : f32
    %53 = vector.broadcast %cst_22 : f32 to vector<2x8xf32>
    %54 = arith.mulf %52, %53 : vector<2x8xf32>
    %55 = vector.extract_strided_slice %54 {offsets = [0, 0], sizes = [1, 8], strides = [1, 1]} : vector<2x8xf32> to vector<1x8xf32>
    %56 = vector.extract_strided_slice %54 {offsets = [1, 0], sizes = [1, 8], strides = [1, 1]} : vector<2x8xf32> to vector<1x8xf32>
    %57 = arith.mulf %55, %55 : vector<1x8xf32>
    %58 = arith.subf %56, %57 : vector<1x8xf32>
    %c0_23 = arith.constant 0 : index
    %c0_24 = arith.constant 0 : index
    %59 = vector.load %arg11[%c0_23, %c0_24] : memref<1x8xf32, #tpu.memory_space<vmem>>, vector<1x8xf32>
    %cst_25 = arith.constant 9.99999974E-6 : f32
    %60 = vector.broadcast %cst_25 : f32 to vector<1x8xf32>
    %61 = arith.addf %58, %60 : vector<1x8xf32>
    %62 = math.rsqrt %61 : vector<1x8xf32>
    %63 = arith.mulf %59, %62 : vector<1x8xf32>
    %c0_26 = arith.constant 0 : index
    %c0_27 = arith.constant 0 : index
    %64 = vector.load %arg12[%c0_26, %c0_27] : memref<1x8xf32, #tpu.memory_space<vmem>>, vector<1x8xf32>
    %65 = arith.mulf %55, %63 : vector<1x8xf32>
    %66 = arith.subf %64, %65 : vector<1x8xf32>
    %67 = tpu.concatenate %63, %66 in 0 : vector<1x8xf32>, vector<1x8xf32> -> vector<2x8xf32>
    %c0_28 = arith.constant 0 : index
    %c0_29 = arith.constant 0 : index
    %68 = vector.load %arg20[%c0_28, %c0_29] : memref<8x128xf32, #tpu.memory_space<vmem>>, vector<8x128xf32>
    %cst_30 = arith.constant dense<0.000000e+00> : vector<2x128xf32>
    %69 = tpu.matmul %67, %68, %cst_30 {dimension_numbers = #tpu.dot_dimension_numbers<[1], [0], [0], [1], [0, 0, 1, 1], [], []>} : vector<2x8xf32>, vector<8x128xf32>, vector<2x128xf32> -> vector<2x128xf32>
    %70 = vector.extract_strided_slice %69 {offsets = [0, 0], sizes = [1, 128], strides = [1, 1]} : vector<2x128xf32> to vector<1x128xf32>
    %71 = vector.broadcast %70 : vector<1x128xf32> to vector<32x128xf32>
    %72 = arith.mulf %44, %71 : vector<32x128xf32>
    %73 = vector.extract_strided_slice %69 {offsets = [1, 0], sizes = [1, 128], strides = [1, 1]} : vector<2x128xf32> to vector<1x128xf32>
    %74 = vector.broadcast %73 : vector<1x128xf32> to vector<32x128xf32>
    %75 = arith.addf %72, %74 : vector<32x128xf32>
    %c2_i32 = arith.constant 2 : i32
    %76 = tpu.dynamic_rotate %75 by %c2_i32 dim 0 : vector<32x128xf32>, i32 -> vector<32x128xf32>
    %c2_i32_31 = arith.constant 2 : i32
    %77 = vector.broadcast %c2_i32_31 : i32 to vector<32x1xi32>
    %78 = arith.cmpi sge, %17, %77 : vector<32x1xi32>
    %cst_32 = arith.constant 0.000000e+00 : f32
    %79 = vector.shape_cast %78 : vector<32x1xi1> to vector<32x1xi1>
    %80 = vector.broadcast %79 : vector<32x1xi1> to vector<32x128xi1>
    %81 = vector.broadcast %cst_32 : f32 to vector<32x128xf32>
    %82 = arith.select %80, %76, %81 : vector<32x128xi1>, vector<32x128xf32>
    %c30_i32 = arith.constant 30 : i32
    %83 = tpu.dynamic_rotate %75 by %c30_i32 dim 0 : vector<32x128xf32>, i32 -> vector<32x128xf32>
    %c14_i32 = arith.constant 14 : i32
    %84 = vector.broadcast %c14_i32 : i32 to vector<32x1xi32>
    %85 = arith.cmpi slt, %17, %84 : vector<32x1xi32>
    %cst_33 = arith.constant 0.000000e+00 : f32
    %86 = vector.shape_cast %85 : vector<32x1xi1> to vector<32x1xi1>
    %87 = vector.broadcast %86 : vector<32x1xi1> to vector<32x128xi1>
    %88 = vector.broadcast %cst_33 : f32 to vector<32x128xf32>
    %89 = arith.select %87, %83, %88 : vector<32x128xi1>, vector<32x128xf32>
    %90 = tpu.concatenate %82, %75, %89 in 1 : vector<32x128xf32>, vector<32x128xf32>, vector<32x128xf32> -> vector<32x384xf32>
    %91 = arith.truncf %90 : vector<32x384xf32> to vector<32x384xbf16>
    %c0_34 = arith.constant 0 : index
    %c0_35 = arith.constant 0 : index
    %92 = vector.load %arg5[%c0_34, %c0_35] : memref<384x128xbf16, #tpu.memory_space<vmem>>, vector<384x128xbf16>
    %cst_36 = arith.constant dense<0.000000e+00> : vector<32x128xf32>
    %93 = tpu.matmul %91, %92, %cst_36 {dimension_numbers = #tpu.dot_dimension_numbers<[1], [0], [0], [1], [0, 0, 1, 1], [], []>} : vector<32x384xbf16>, vector<384x128xbf16>, vector<32x128xf32> -> vector<32x128xf32>
    %c0_37 = arith.constant 0 : index
    %c0_38 = arith.constant 0 : index
    %94 = vector.load %arg6[%c0_37, %c0_38] : memref<1x128xf32, #tpu.memory_space<vmem>>, vector<1x128xf32>
    %95 = vector.broadcast %94 : vector<1x128xf32> to vector<32x128xf32>
    %96 = arith.addf %93, %95 : vector<32x128xf32>
    %cst_39 = arith.constant dense<0.000000e+00> : vector<128xf32>
    %97 = vector.multi_reduction <add>, %96, %cst_39 [0] : vector<32x128xf32> to vector<128xf32>
    %98 = vector.shape_cast %97 : vector<128xf32> to vector<1x128xf32>
    %99 = arith.mulf %96, %96 : vector<32x128xf32>
    %cst_40 = arith.constant dense<0.000000e+00> : vector<128xf32>
    %100 = vector.multi_reduction <add>, %99, %cst_40 [0] : vector<32x128xf32> to vector<128xf32>
    %101 = vector.shape_cast %100 : vector<128xf32> to vector<1x128xf32>
    %102 = tpu.concatenate %98, %101 in 0 : vector<1x128xf32>, vector<1x128xf32> -> vector<2x128xf32>
    %c0_41 = arith.constant 0 : index
    %c0_42 = arith.constant 0 : index
    %103 = vector.load %arg19[%c0_41, %c0_42] : memref<128x8xf32, #tpu.memory_space<vmem>>, vector<128x8xf32>
    %cst_43 = arith.constant dense<0.000000e+00> : vector<2x8xf32>
    %104 = tpu.matmul %102, %103, %cst_43 {dimension_numbers = #tpu.dot_dimension_numbers<[1], [0], [0], [1], [0, 0, 1, 1], [], []>} : vector<2x128xf32>, vector<128x8xf32>, vector<2x8xf32> -> vector<2x8xf32>
    %cst_44 = arith.constant 0.001953125 : f32
    %105 = vector.broadcast %cst_44 : f32 to vector<2x8xf32>
    %106 = arith.mulf %104, %105 : vector<2x8xf32>
    %107 = vector.extract_strided_slice %106 {offsets = [0, 0], sizes = [1, 8], strides = [1, 1]} : vector<2x8xf32> to vector<1x8xf32>
    %108 = vector.extract_strided_slice %106 {offsets = [1, 0], sizes = [1, 8], strides = [1, 1]} : vector<2x8xf32> to vector<1x8xf32>
    %109 = arith.mulf %107, %107 : vector<1x8xf32>
    %110 = arith.subf %108, %109 : vector<1x8xf32>
    %c0_45 = arith.constant 0 : index
    %c0_46 = arith.constant 0 : index
    %111 = vector.load %arg13[%c0_45, %c0_46] : memref<1x8xf32, #tpu.memory_space<vmem>>, vector<1x8xf32>
    %cst_47 = arith.constant 9.99999974E-6 : f32
    %112 = vector.broadcast %cst_47 : f32 to vector<1x8xf32>
    %113 = arith.addf %110, %112 : vector<1x8xf32>
    %114 = math.rsqrt %113 : vector<1x8xf32>
    %115 = arith.mulf %111, %114 : vector<1x8xf32>
    %c0_48 = arith.constant 0 : index
    %c0_49 = arith.constant 0 : index
    %116 = vector.load %arg14[%c0_48, %c0_49] : memref<1x8xf32, #tpu.memory_space<vmem>>, vector<1x8xf32>
    %117 = arith.mulf %107, %115 : vector<1x8xf32>
    %118 = arith.subf %116, %117 : vector<1x8xf32>
    %119 = tpu.concatenate %115, %118 in 0 : vector<1x8xf32>, vector<1x8xf32> -> vector<2x8xf32>
    %c0_50 = arith.constant 0 : index
    %c0_51 = arith.constant 0 : index
    %120 = vector.load %arg20[%c0_50, %c0_51] : memref<8x128xf32, #tpu.memory_space<vmem>>, vector<8x128xf32>
    %cst_52 = arith.constant dense<0.000000e+00> : vector<2x128xf32>
    %121 = tpu.matmul %119, %120, %cst_52 {dimension_numbers = #tpu.dot_dimension_numbers<[1], [0], [0], [1], [0, 0, 1, 1], [], []>} : vector<2x8xf32>, vector<8x128xf32>, vector<2x128xf32> -> vector<2x128xf32>
    %122 = vector.extract_strided_slice %121 {offsets = [0, 0], sizes = [1, 128], strides = [1, 1]} : vector<2x128xf32> to vector<1x128xf32>
    %123 = vector.broadcast %122 : vector<1x128xf32> to vector<32x128xf32>
    %124 = arith.mulf %96, %123 : vector<32x128xf32>
    %125 = vector.extract_strided_slice %121 {offsets = [1, 0], sizes = [1, 128], strides = [1, 1]} : vector<2x128xf32> to vector<1x128xf32>
    %126 = vector.broadcast %125 : vector<1x128xf32> to vector<32x128xf32>
    %127 = arith.addf %124, %126 : vector<32x128xf32>
    %c1_i32_53 = arith.constant 1 : i32
    %128 = tpu.dynamic_rotate %127 by %c1_i32_53 dim 0 : vector<32x128xf32>, i32 -> vector<32x128xf32>
    %c1_i32_54 = arith.constant 1 : i32
    %129 = vector.broadcast %c1_i32_54 : i32 to vector<32x1xi32>
    %130 = arith.cmpi sge, %17, %129 : vector<32x1xi32>
    %cst_55 = arith.constant 0.000000e+00 : f32
    %131 = vector.shape_cast %130 : vector<32x1xi1> to vector<32x1xi1>
    %132 = vector.broadcast %131 : vector<32x1xi1> to vector<32x128xi1>
    %133 = vector.broadcast %cst_55 : f32 to vector<32x128xf32>
    %134 = arith.select %132, %128, %133 : vector<32x128xi1>, vector<32x128xf32>
    %c31_i32_56 = arith.constant 31 : i32
    %135 = tpu.dynamic_rotate %127 by %c31_i32_56 dim 0 : vector<32x128xf32>, i32 -> vector<32x128xf32>
    %c15_i32_57 = arith.constant 15 : i32
    %136 = vector.broadcast %c15_i32_57 : i32 to vector<32x1xi32>
    %137 = arith.cmpi slt, %17, %136 : vector<32x1xi32>
    %cst_58 = arith.constant 0.000000e+00 : f32
    %138 = vector.shape_cast %137 : vector<32x1xi1> to vector<32x1xi1>
    %139 = vector.broadcast %138 : vector<32x1xi1> to vector<32x128xi1>
    %140 = vector.broadcast %cst_58 : f32 to vector<32x128xf32>
    %141 = arith.select %139, %135, %140 : vector<32x128xi1>, vector<32x128xf32>
    %142 = tpu.concatenate %134, %141 in 1 : vector<32x128xf32>, vector<32x128xf32> -> vector<32x256xf32>
    %143 = arith.truncf %142 : vector<32x256xf32> to vector<32x256xbf16>
    %c0_59 = arith.constant 0 : index
    %c0_60 = arith.constant 0 : index
    %144 = vector.load %arg7[%c0_59, %c0_60] : memref<256x128xbf16, #tpu.memory_space<vmem>>, vector<256x128xbf16>
    %cst_61 = arith.constant dense<0.000000e+00> : vector<32x128xf32>
    %145 = tpu.matmul %143, %144, %cst_61 {dimension_numbers = #tpu.dot_dimension_numbers<[1], [0], [0], [1], [0, 0, 1, 1], [], []>} : vector<32x256xbf16>, vector<256x128xbf16>, vector<32x128xf32> -> vector<32x128xf32>
    %c0_62 = arith.constant 0 : index
    %c0_63 = arith.constant 0 : index
    %146 = vector.load %arg8[%c0_62, %c0_63] : memref<1x128xf32, #tpu.memory_space<vmem>>, vector<1x128xf32>
    %147 = vector.broadcast %146 : vector<1x128xf32> to vector<32x128xf32>
    %148 = arith.addf %145, %147 : vector<32x128xf32>
    %cst_64 = arith.constant dense<0.000000e+00> : vector<128xf32>
    %149 = vector.multi_reduction <add>, %148, %cst_64 [0] : vector<32x128xf32> to vector<128xf32>
    %150 = vector.shape_cast %149 : vector<128xf32> to vector<1x128xf32>
    %151 = arith.mulf %148, %148 : vector<32x128xf32>
    %cst_65 = arith.constant dense<0.000000e+00> : vector<128xf32>
    %152 = vector.multi_reduction <add>, %151, %cst_65 [0] : vector<32x128xf32> to vector<128xf32>
    %153 = vector.shape_cast %152 : vector<128xf32> to vector<1x128xf32>
    %154 = tpu.concatenate %150, %153 in 0 : vector<1x128xf32>, vector<1x128xf32> -> vector<2x128xf32>
    %c0_66 = arith.constant 0 : index
    %c0_67 = arith.constant 0 : index
    %155 = vector.load %arg19[%c0_66, %c0_67] : memref<128x8xf32, #tpu.memory_space<vmem>>, vector<128x8xf32>
    %cst_68 = arith.constant dense<0.000000e+00> : vector<2x8xf32>
    %156 = tpu.matmul %154, %155, %cst_68 {dimension_numbers = #tpu.dot_dimension_numbers<[1], [0], [0], [1], [0, 0, 1, 1], [], []>} : vector<2x128xf32>, vector<128x8xf32>, vector<2x8xf32> -> vector<2x8xf32>
    %cst_69 = arith.constant 0.001953125 : f32
    %157 = vector.broadcast %cst_69 : f32 to vector<2x8xf32>
    %158 = arith.mulf %156, %157 : vector<2x8xf32>
    %159 = vector.extract_strided_slice %158 {offsets = [0, 0], sizes = [1, 8], strides = [1, 1]} : vector<2x8xf32> to vector<1x8xf32>
    %160 = vector.extract_strided_slice %158 {offsets = [1, 0], sizes = [1, 8], strides = [1, 1]} : vector<2x8xf32> to vector<1x8xf32>
    %161 = arith.mulf %159, %159 : vector<1x8xf32>
    %162 = arith.subf %160, %161 : vector<1x8xf32>
    %c0_70 = arith.constant 0 : index
    %c0_71 = arith.constant 0 : index
    %163 = vector.load %arg15[%c0_70, %c0_71] : memref<1x8xf32, #tpu.memory_space<vmem>>, vector<1x8xf32>
    %cst_72 = arith.constant 9.99999974E-6 : f32
    %164 = vector.broadcast %cst_72 : f32 to vector<1x8xf32>
    %165 = arith.addf %162, %164 : vector<1x8xf32>
    %166 = math.rsqrt %165 : vector<1x8xf32>
    %167 = arith.mulf %163, %166 : vector<1x8xf32>
    %c0_73 = arith.constant 0 : index
    %c0_74 = arith.constant 0 : index
    %168 = vector.load %arg16[%c0_73, %c0_74] : memref<1x8xf32, #tpu.memory_space<vmem>>, vector<1x8xf32>
    %169 = arith.mulf %159, %167 : vector<1x8xf32>
    %170 = arith.subf %168, %169 : vector<1x8xf32>
    %171 = tpu.concatenate %167, %170 in 0 : vector<1x8xf32>, vector<1x8xf32> -> vector<2x8xf32>
    %c0_75 = arith.constant 0 : index
    %c0_76 = arith.constant 0 : index
    %172 = vector.load %arg20[%c0_75, %c0_76] : memref<8x128xf32, #tpu.memory_space<vmem>>, vector<8x128xf32>
    %cst_77 = arith.constant dense<0.000000e+00> : vector<2x128xf32>
    %173 = tpu.matmul %171, %172, %cst_77 {dimension_numbers = #tpu.dot_dimension_numbers<[1], [0], [0], [1], [0, 0, 1, 1], [], []>} : vector<2x8xf32>, vector<8x128xf32>, vector<2x128xf32> -> vector<2x128xf32>
    %174 = vector.extract_strided_slice %173 {offsets = [0, 0], sizes = [1, 128], strides = [1, 1]} : vector<2x128xf32> to vector<1x128xf32>
    %175 = vector.broadcast %174 : vector<1x128xf32> to vector<32x128xf32>
    %176 = arith.mulf %148, %175 : vector<32x128xf32>
    %177 = vector.extract_strided_slice %173 {offsets = [1, 0], sizes = [1, 128], strides = [1, 1]} : vector<2x128xf32> to vector<1x128xf32>
    %178 = vector.broadcast %177 : vector<1x128xf32> to vector<32x128xf32>
    %179 = arith.addf %176, %178 : vector<32x128xf32>
    %180 = tpu.concatenate %75, %127, %179 in 1 : vector<32x128xf32>, vector<32x128xf32>, vector<32x128xf32> -> vector<32x384xf32>
    %181 = arith.truncf %180 : vector<32x384xf32> to vector<32x384xbf16>
    %c0_78 = arith.constant 0 : index
    %c0_79 = arith.constant 0 : index
    %182 = vector.load %arg9[%c0_78, %c0_79] : memref<384x128xbf16, #tpu.memory_space<vmem>>, vector<384x128xbf16>
    %cst_80 = arith.constant dense<0.000000e+00> : vector<32x128xf32>
    %183 = tpu.matmul %181, %182, %cst_80 {dimension_numbers = #tpu.dot_dimension_numbers<[1], [0], [0], [1], [0, 0, 1, 1], [], []>} : vector<32x384xbf16>, vector<384x128xbf16>, vector<32x128xf32> -> vector<32x128xf32>
    %c0_81 = arith.constant 0 : index
    %c0_82 = arith.constant 0 : index
    %184 = vector.load %arg10[%c0_81, %c0_82] : memref<1x128xf32, #tpu.memory_space<vmem>>, vector<1x128xf32>
    %185 = vector.broadcast %184 : vector<1x128xf32> to vector<32x128xf32>
    %186 = arith.addf %183, %185 : vector<32x128xf32>
    %cst_83 = arith.constant dense<0.000000e+00> : vector<128xf32>
    %187 = vector.multi_reduction <add>, %186, %cst_83 [0] : vector<32x128xf32> to vector<128xf32>
    %188 = vector.shape_cast %187 : vector<128xf32> to vector<1x128xf32>
    %189 = arith.mulf %186, %186 : vector<32x128xf32>
    %cst_84 = arith.constant dense<0.000000e+00> : vector<128xf32>
    %190 = vector.multi_reduction <add>, %189, %cst_84 [0] : vector<32x128xf32> to vector<128xf32>
    %191 = vector.shape_cast %190 : vector<128xf32> to vector<1x128xf32>
    %192 = tpu.concatenate %188, %191 in 0 : vector<1x128xf32>, vector<1x128xf32> -> vector<2x128xf32>
    %c0_85 = arith.constant 0 : index
    %c0_86 = arith.constant 0 : index
    %193 = vector.load %arg19[%c0_85, %c0_86] : memref<128x8xf32, #tpu.memory_space<vmem>>, vector<128x8xf32>
    %cst_87 = arith.constant dense<0.000000e+00> : vector<2x8xf32>
    %194 = tpu.matmul %192, %193, %cst_87 {dimension_numbers = #tpu.dot_dimension_numbers<[1], [0], [0], [1], [0, 0, 1, 1], [], []>} : vector<2x128xf32>, vector<128x8xf32>, vector<2x8xf32> -> vector<2x8xf32>
    %cst_88 = arith.constant 0.001953125 : f32
    %195 = vector.broadcast %cst_88 : f32 to vector<2x8xf32>
    %196 = arith.mulf %194, %195 : vector<2x8xf32>
    %197 = vector.extract_strided_slice %196 {offsets = [0, 0], sizes = [1, 8], strides = [1, 1]} : vector<2x8xf32> to vector<1x8xf32>
    %198 = vector.extract_strided_slice %196 {offsets = [1, 0], sizes = [1, 8], strides = [1, 1]} : vector<2x8xf32> to vector<1x8xf32>
    %199 = arith.mulf %197, %197 : vector<1x8xf32>
    %200 = arith.subf %198, %199 : vector<1x8xf32>
    %c0_89 = arith.constant 0 : index
    %c0_90 = arith.constant 0 : index
    %201 = vector.load %arg17[%c0_89, %c0_90] : memref<1x8xf32, #tpu.memory_space<vmem>>, vector<1x8xf32>
    %cst_91 = arith.constant 9.99999974E-6 : f32
    %202 = vector.broadcast %cst_91 : f32 to vector<1x8xf32>
    %203 = arith.addf %200, %202 : vector<1x8xf32>
    %204 = math.rsqrt %203 : vector<1x8xf32>
    %205 = arith.mulf %201, %204 : vector<1x8xf32>
    %c0_92 = arith.constant 0 : index
    %c0_93 = arith.constant 0 : index
    %206 = vector.load %arg18[%c0_92, %c0_93] : memref<1x8xf32, #tpu.memory_space<vmem>>, vector<1x8xf32>
    %207 = arith.mulf %197, %205 : vector<1x8xf32>
    %208 = arith.subf %206, %207 : vector<1x8xf32>
    %209 = tpu.concatenate %205, %208 in 0 : vector<1x8xf32>, vector<1x8xf32> -> vector<2x8xf32>
    %c0_94 = arith.constant 0 : index
    %c0_95 = arith.constant 0 : index
    %210 = vector.load %arg20[%c0_94, %c0_95] : memref<8x128xf32, #tpu.memory_space<vmem>>, vector<8x128xf32>
    %cst_96 = arith.constant dense<0.000000e+00> : vector<2x128xf32>
    %211 = tpu.matmul %209, %210, %cst_96 {dimension_numbers = #tpu.dot_dimension_numbers<[1], [0], [0], [1], [0, 0, 1, 1], [], []>} : vector<2x8xf32>, vector<8x128xf32>, vector<2x128xf32> -> vector<2x128xf32>
    %212 = vector.extract_strided_slice %211 {offsets = [0, 0], sizes = [1, 128], strides = [1, 1]} : vector<2x128xf32> to vector<1x128xf32>
    %213 = vector.broadcast %212 : vector<1x128xf32> to vector<32x128xf32>
    %214 = arith.mulf %186, %213 : vector<32x128xf32>
    %215 = vector.extract_strided_slice %211 {offsets = [1, 0], sizes = [1, 128], strides = [1, 1]} : vector<2x128xf32> to vector<1x128xf32>
    %216 = vector.broadcast %215 : vector<1x128xf32> to vector<32x128xf32>
    %217 = arith.addf %214, %216 : vector<32x128xf32>
    %218 = arith.addf %23, %217 : vector<32x128xf32>
    %c0_97 = arith.constant 0 : index
    %c0_98 = arith.constant 0 : index
    %219 = vector.load %arg21[%c0_97, %c0_98] : memref<32x128xf32, #tpu.memory_space<vmem>>, vector<32x128xf32>
    tpu.vector_store %arg21[%c0_97, %c0_98], %218 {strides = array<i32>} : memref<32x128xf32, #tpu.memory_space<vmem>>, vector<32x128xf32>,
    return
  }
}

</mosaic_0001>

<bundles_post_ra>
// kernel: tpu_custom_call.1
= control target key start
LH: loop header
LB: loop body
LE: loop exit
PB: predicated region body
PF: predicated region fallthrough
CT: control target
= control target key end

     0   :  { %s4175_s0 = inlined_call_operand.vmem [shape: f32[32,64], index: 0, kind: input, shape index: {}]   ;;  %s4176_s1 = inlined_call_operand.hbm [shape: bf16[64,128], index: 1, kind: input, shape index: {}]   ;;  %s4177_s2 = inlined_call_operand.vmem [shape: f32[1,128], index: 2, kind: input, shape index: {}]   ;;  %s4178_s3 = inlined_call_operand.hbm [shape: bf16[192,128], index: 3, kind: input, shape index: {}]   ;;  %s4179_s4 = inlined_call_operand.hbm [shape: f32[1,128], index: 4, kind: input, shape index: {}]   ;;  %s4180_s5 = inlined_call_operand.hbm [shape: bf16[384,128], index: 5, kind: input, shape index: {}]   ;;  %s4181_s6 = inlined_call_operand.hbm [shape: f32[1,128], index: 6, kind: input, shape index: {}]   ;;  %s4182_s7 = inlined_call_operand.vmem [shape: bf16[256,128], index: 7, kind: input, shape index: {}]   ;;  %s4183_s8 = inlined_call_operand.hbm [shape: f32[1,128], index: 8, kind: input, shape index: {}]   ;;  %s4184_s9 = inlined_call_operand.hbm [shape: bf16[384,128], index: 9, kind: input, shape index: {}]   ;;  %s4185_s10 = inlined_call_operand.hbm [shape: f32[1,128], index: 10, kind: input, shape index: {}]   ;;  %s4186_s11 = inlined_call_operand.hbm [shape: f32[1,8], index: 11, kind: input, shape index: {}]   ;;  %s4187_s12 = inlined_call_operand.vmem [shape: f32[1,8], index: 12, kind: input, shape index: {}]   ;;  %s4188_s13 = inlined_call_operand.vmem [shape: f32[1,8], index: 13, kind: input, shape index: {}]   ;;  %s4189_s14 = inlined_call_operand.vmem [shape: f32[1,8], index: 14, kind: input, shape index: {}]   ;;  %s4190_s15 = inlined_call_operand.vmem [shape: f32[1,8], index: 15, kind: input, shape index: {}]   ;;  %s4191_s16 = inlined_call_operand.vmem [shape: f32[1,8], index: 16, kind: input, shape index: {}]   ;;  %s4192_s17 = inlined_call_operand.vmem [shape: f32[1,8], index: 17, kind: input, shape index: {}]   ;;  %s4193_s18 = inlined_call_operand.vmem [shape: f32[1,8], index: 18, kind: input, shape index: {}]   ;;  %s4194_s19 = inlined_call_operand.vmem [shape: f32[128,8], index: 19, kind: input, shape index: {}]   ;;  %s4195_s20 = inlined_call_operand.vmem [shape: f32[8,128], index: 20, kind: input, shape index: {}]   ;;  %s4196_s21 = inlined_call_operand.hbm [shape: f32[32,128], index: 21, kind: output, shape index: {}]  }
   0x1   :  { %4204 = sst [smem:[#allocation24_spill]] %s4175_s0 }
   0x2   :  { %4205 = sst [smem:[#allocation25_spill]] %s4176_s1 }
   0x3   :  { %4206 = sst [smem:[#allocation26_spill]] %s4177_s2 }
   0x4   :  { %4207 = sst [smem:[#allocation27_spill]] %s4178_s3 }
   0x5   :  { %4208 = sst [smem:[#allocation28_spill]] %s4179_s4 }
   0x6   :  { %4209 = sst [smem:[#allocation29_spill]] %s4180_s5 }
   0x7   :  { %4210 = sst [smem:[#allocation30_spill]] %s4193_s18 }
   0x8   :  { %4211 = sst [smem:[#allocation31_spill]] %s4196_s21 }
   0x9   :  { %26 = vsyncpa [#allocation3], 0 }
   0xa   :  { %27 = vsyncpa [#allocation6], 0 }
   0xb   :  { %28 = vsyncpa [#allocation9], 0 }
   0xc   :  { %29 = vsyncpa [#allocation12], 0 }
   0xd   :  { %30 = vsyncpa [#allocation15], 0 }
   0xe   :  { %31 = vsyncpa [#allocation4], 0  ;;  %s3319_s2 = smov [#allocation5]   ;;  %s3320_s26 = smov [#allocation8]  }
   0xf   :  { %s53_s25 = sshll.u32 %s3319_s2, 4  ;;  %s75_s27 = sshll.u32 %s3320_s26, 4  ;;  %s54_s25 = int_to_ptr.vmem [resolvable:$true] %s53_s25  ;;  %s3449_s27 = int_to_ptr.vmem [resolvable:$true] %s75_s27 }
  0x10   :  { %s4212_s29 = sld [smem:[#allocation27_spill]] }
  0x16   :  { %s3087_s0 = scalar_lea.hbm %s4212_s29, 1536 }
  0x17   :  { %p3088_p0 = scmp.ne.s32.totalorder %s4212_s29, %s3087_s0  ;;  %p3091_p1 = scmp.lt.u32.totalorder %s3087_s0, %s4212_s29 }
  0x19   :  { %p3093_p2 = pnand %p3091_p1, %p3088_p0 }
  0x1b   :  { %3096 = shalt.err (!%p3093_p2)
}
  0x1c   :  { %s3097_s23 = scalar_lea.vmem %s54_s25, 1536  ;;  %p3102_p4 = scmp.lt.s32.totalorder %s54_s25, %s54_s25 }
  0x1d   :  { %p3098_p3 = scmp.ne.s32.totalorder %s54_s25, %s3097_s23  ;;  %p3103_p5 = scmp.lt.s32.totalorder %s3097_s23, %s3097_s23 }
  0x1f   :  { %p3104_p6 = por %p3103_p5, %p3102_p4 }
  0x21   :  { %p3105_p7 = pnand %p3104_p6, %p3098_p3 }
  0x23   :  { %3108 = shalt.err (!%p3105_p7)
}
  0x24   :  { %s3321_s1 = smov 64   ;;  %s3322_s24 = smov 4  }
  0x25   :  { %59 = dma.hbm_to_vmem [thread:$0]  %s4212_s29, 1536, %s54_s25, [#allocation6], %s3321_s1, %s3321_s1, %s3322_s24  }
  0x26   :  { %s4213_s0 = sld [smem:[#allocation29_spill]] }
  0x2c   :  { %s3109_s4 = scalar_lea.hbm %s4213_s0, 3072 }
  0x2d   :  { %p3110_p8 = scmp.ne.s32.totalorder %s4213_s0, %s3109_s4  ;;  %p3113_p9 = scmp.lt.u32.totalorder %s3109_s4, %s4213_s0 }
  0x2f   :  { %p3115_p10 = pnand %p3113_p9, %p3110_p8 }
  0x31   :  { %3118 = shalt.err (!%p3115_p10)
}
  0x32   :  { %s3119_s21 = scalar_lea.vmem %s3449_s27, 3072  ;;  %p3124_p12 = scmp.lt.s32.totalorder %s3449_s27, %s3449_s27 }
  0x33   :  { %p3120_p11 = scmp.ne.s32.totalorder %s3449_s27, %s3119_s21  ;;  %p3125_p13 = scmp.lt.s32.totalorder %s3119_s21, %s3119_s21 }
  0x35   :  { %p3126_p0 = por %p3125_p13, %p3124_p12 }
  0x37   :  { %p3127_p1 = pnand %p3126_p0, %p3120_p11 }
  0x39   :  { %3130 = shalt.err (!%p3127_p1)
}
  0x3a   :  { %81 = dma.hbm_to_vmem [thread:$0]  %s4213_s0, 3072, %s3449_s27, [#allocation9], %s3321_s1, %s3321_s1, %s3322_s24  }
  0x3b   :  { %s3323_s2 = smov [#allocation11]   ;;  %s3324_s3 = smov [#allocation14]  }
  0x3c   :  { %s100_s26 = sshll.u32 %s3323_s2, 4  ;;  %s122_s28 = sshll.u32 %s3324_s3, 4  ;;  %s101_s26 = int_to_ptr.vmem [resolvable:$true] %s100_s26  ;;  %s123_s28 = int_to_ptr.vmem [resolvable:$true] %s122_s28 }
  0x3d   :  { %s3131_s21 = scalar_lea.hbm %s4183_s8, 16 }
  0x3e   :  { %p3132_p2 = scmp.ne.s32.totalorder %s4183_s8, %s3131_s21  ;;  %p3135_p3 = scmp.lt.u32.totalorder %s3131_s21, %s4183_s8 }
  0x40   :  { %p3137_p4 = pnand %p3135_p3, %p3132_p2 }
  0x42   :  { %3140 = shalt.err (!%p3137_p4)
}
  0x43   :  { %s3141_s27 = scalar_lea.vmem %s101_s26, 16  ;;  %s3145_s0 = scalar_lea.vmem %s101_s26, 32 }
  0x44   :  { %p3142_p5 = scmp.ne.s32.totalorder %s101_s26, %s3141_s27  ;;  %p3146_p6 = scmp.lt.s32.totalorder %s101_s26, %s101_s26 }
  0x45   :  { %p3147_p7 = scmp.lt.s32.totalorder %s3145_s0, %s3141_s27 }
  0x47   :  { %p3148_p8 = por %p3147_p7, %p3146_p6 }
  0x49   :  { %p3149_p9 = pnand %p3148_p8, %p3142_p5 }
  0x4b   :  { %3152 = shalt.err (!%p3149_p9)
}
  0x4c   :  { %103 = dma.hbm_to_vmem [thread:$0]  %s4183_s8, 16, %s101_s26, [#allocation12]  }
  0x4d   :  { %s3153_s4 = scalar_lea.hbm %s4185_s10, 16 }
  0x4e   :  { %p3154_p10 = scmp.ne.s32.totalorder %s4185_s10, %s3153_s4  ;;  %p3157_p11 = scmp.lt.u32.totalorder %s3153_s4, %s4185_s10 }
  0x50   :  { %p3159_p12 = pnand %p3157_p11, %p3154_p10 }
  0x52   :  { %3162 = shalt.err (!%p3159_p12)
}
  0x53   :  { %s3163_s22 = scalar_lea.vmem %s123_s28, 16  ;;  %s3167_s23 = scalar_lea.vmem %s123_s28, 32 }
  0x54   :  { %p3164_p13 = scmp.ne.s32.totalorder %s123_s28, %s3163_s22  ;;  %p3168_p0 = scmp.lt.s32.totalorder %s123_s28, %s123_s28 }
  0x55   :  { %p3169_p1 = scmp.lt.s32.totalorder %s3167_s23, %s3163_s22 }
  0x57   :  { %p3170_p2 = por %p3169_p1, %p3168_p0 }
  0x59   :  { %p3171_p3 = pnand %p3170_p2, %p3164_p13 }
  0x5b   :  { %3174 = shalt.err (!%p3171_p3)
}
  0x5c   :  { %125 = dma.hbm_to_vmem [thread:$0]  %s4185_s10, 16, %s123_s28, [#allocation15]  }
  0x5d   :  { %s3325_s27 = smov [#allocation2]   ;;  %s3326_s25 = smov [#allocation7]  }
  0x5e   :  { %s39_s0 = sshll.u32 %s3325_s27, 4  ;;  %s66_s29 = sshll.u32 %s3326_s25, 4  ;;  %s40_s0 = int_to_ptr.vmem [resolvable:$true] %s39_s0  ;;  %s67_s29 = int_to_ptr.vmem [resolvable:$true] %s66_s29 }
  0x5f   :  { %s4214_s4 = sld [smem:[#allocation25_spill]] }
  0x65   :  { %s3175_s18 = scalar_lea.hbm %s4214_s4, 512 }
  0x66   :  { %p3176_p4 = scmp.ne.s32.totalorder %s4214_s4, %s3175_s18  ;;  %p3179_p5 = scmp.lt.u32.totalorder %s3175_s18, %s4214_s4 }
  0x68   :  { %p3181_p6 = pnand %p3179_p5, %p3176_p4 }
  0x6a   :  { %3184 = shalt.err (!%p3181_p6)
}
  0x6b   :  { %s3185_s10 = scalar_lea.vmem %s40_s0, 512  ;;  %p3190_p8 = scmp.lt.s32.totalorder %s40_s0, %s40_s0 }
  0x6c   :  { %p3186_p7 = scmp.ne.s32.totalorder %s40_s0, %s3185_s10  ;;  %p3191_p9 = scmp.lt.s32.totalorder %s3185_s10, %s3185_s10 }
  0x6e   :  { %p3192_p10 = por %p3191_p9, %p3190_p8 }
  0x70   :  { %p3193_p11 = pnand %p3192_p10, %p3186_p7 }
  0x72   :  { %3196 = shalt.err (!%p3193_p11)
}
  0x73   :  { %45 = dma.hbm_to_vmem [thread:$0]  %s4214_s4, 512, %s40_s0, [#allocation3], %s3321_s1, %s3321_s1, %s3322_s24  }
  0x74   :  { %s4215_s27 = sld [smem:[#allocation28_spill]] }
  0x7a   :  { %s3197_s25 = scalar_lea.hbm %s4215_s27, 16 }
  0x7b   :  { %p3198_p12 = scmp.ne.s32.totalorder %s4215_s27, %s3197_s25  ;;  %p3201_p13 = scmp.lt.u32.totalorder %s3197_s25, %s4215_s27 }
  0x7d   :  { %p3203_p0 = pnand %p3201_p13, %p3198_p12 }
  0x7f   :  { %3206 = shalt.err (!%p3203_p0)
}
  0x80   :  { %s3207_s21 = scalar_lea.vmem %s67_s29, 16  ;;  %s3211_s5 = scalar_lea.vmem %s67_s29, 32 }
  0x81   :  { %p3208_p1 = scmp.ne.s32.totalorder %s67_s29, %s3207_s21  ;;  %p3212_p2 = scmp.lt.s32.totalorder %s67_s29, %s67_s29 }
  0x82   :  { %p3213_p3 = scmp.lt.s32.totalorder %s3211_s5, %s3207_s21 }
  0x84   :  { %p3214_p4 = por %p3213_p3, %p3212_p2 }
  0x86   :  { %p3215_p5 = pnand %p3214_p4, %p3208_p1 }
  0x88   :  { %3218 = shalt.err (!%p3215_p5)
}
  0x89   :  { %69 = dma.hbm_to_vmem [thread:$0]  %s4215_s27, 16, %s67_s29, [#allocation6]  }
  0x8a   :  { %s3327_s22 = smov [#allocation10]   ;;  %s3328_s28 = smov [#allocation13]  }
  0x8b   :  { %s88_s10 = sshll.u32 %s3327_s22, 4  ;;  %s109_s23 = sshll.u32 %s3328_s28, 4  ;;  %s89_s10 = int_to_ptr.vmem [resolvable:$true] %s88_s10  ;;  %s3537_s23 = int_to_ptr.vmem [resolvable:$true] %s109_s23 }
  0x8c   :  { %s3219_s25 = scalar_lea.hbm %s4181_s6, 16 }
  0x8d   :  { %p3220_p6 = scmp.ne.s32.totalorder %s4181_s6, %s3219_s25  ;;  %p3223_p7 = scmp.lt.u32.totalorder %s3219_s25, %s4181_s6 }
  0x8f   :  { %p3225_p8 = pnand %p3223_p7, %p3220_p6 }
  0x91   :  { %3228 = shalt.err (!%p3225_p8)
}
  0x92   :  { %s3229_s29 = scalar_lea.vmem %s89_s10, 16  ;;  %s3233_s27 = scalar_lea.vmem %s89_s10, 32 }
  0x93   :  { %p3230_p9 = scmp.ne.s32.totalorder %s89_s10, %s3229_s29  ;;  %p3234_p10 = scmp.lt.s32.totalorder %s89_s10, %s89_s10 }
  0x94   :  { %p3235_p11 = scmp.lt.s32.totalorder %s3233_s27, %s3229_s29 }
  0x96   :  { %p3236_p12 = por %p3235_p11, %p3234_p10 }
  0x98   :  { %p3237_p13 = pnand %p3236_p12, %p3230_p9 }
  0x9a   :  { %3240 = shalt.err (!%p3237_p13)
}
  0x9b   :  { %91 = dma.hbm_to_vmem [thread:$0]  %s4181_s6, 16, %s89_s10, [#allocation9]  }
  0x9c   :  { %s3241_s22 = scalar_lea.hbm %s4184_s9, 3072 }
  0x9d   :  { %p3242_p0 = scmp.ne.s32.totalorder %s4184_s9, %s3241_s22  ;;  %p3245_p1 = scmp.lt.u32.totalorder %s3241_s22, %s4184_s9 }
  0x9f   :  { %p3247_p2 = pnand %p3245_p1, %p3242_p0 }
  0xa1   :  { %3250 = shalt.err (!%p3247_p2)
}
  0xa2   :  { %s3251_s2 = scalar_lea.vmem %s3537_s23, 3072  ;;  %p3256_p4 = scmp.lt.s32.totalorder %s3537_s23, %s3537_s23 }
  0xa3   :  { %p3252_p3 = scmp.ne.s32.totalorder %s3537_s23, %s3251_s2  ;;  %p3257_p5 = scmp.lt.s32.totalorder %s3251_s2, %s3251_s2 }
  0xa5   :  { %p3258_p6 = por %p3257_p5, %p3256_p4 }
  0xa7   :  { %p3259_p7 = pnand %p3258_p6, %p3252_p3 }
  0xa9   :  { %3262 = shalt.err (!%p3259_p7)
}
  0xaa   :  { %115 = dma.hbm_to_vmem [thread:$0]  %s4184_s9, 3072, %s3537_s23, [#allocation12], %s3321_s1, %s3321_s1, %s3322_s24  }
  0xab   :  { %s3329_s3 = smov [#allocation16]   ;;  %s3263_s27 = scalar_lea.hbm %s4186_s11, 16 }
  0xac   :  { %s132_s18 = sshll.u32 %s3329_s3, 4  ;;  %p3264_p8 = scmp.ne.s32.totalorder %s4186_s11, %s3263_s27  ;;  %s133_s18 = int_to_ptr.vmem [resolvable:$true] %s132_s18 }
  0xad   :  { %p3267_p9 = scmp.lt.u32.totalorder %s3263_s27, %s4186_s11 }
  0xaf   :  { %p3269_p10 = pnand %p3267_p9, %p3264_p8 }
  0xb1   :  { %3272 = shalt.err (!%p3269_p10)
}
  0xb2   :  { %s3273_s22 = scalar_lea.vmem %s133_s18, 16  ;;  %s3277_s9 = scalar_lea.vmem %s133_s18, 32 }
  0xb3   :  { %p3274_p11 = scmp.ne.s32.totalorder %s133_s18, %s3273_s22  ;;  %p3278_p12 = scmp.lt.s32.totalorder %s133_s18, %s133_s18 }
  0xb4   :  { %p3279_p13 = scmp.lt.s32.totalorder %s3277_s9, %s3273_s22 }
  0xb6   :  { %p3280_p0 = por %p3279_p13, %p3278_p12 }
  0xb8   :  { %p3281_p1 = pnand %p3280_p0, %p3274_p11 }
  0xba   :  { %3284 = shalt.err (!%p3281_p1)
}
  0xbb   :  { %135 = dma.hbm_to_vmem [thread:$0]  %s4186_s11, 16, %s133_s18, [#allocation15]  }
  0xbc   :  { %3307 = dma.done.wait [#allocation3], 512  }
  0xbd   :  { %3308 = vsyncadd [#allocation3], 4294966784 }
  0xbe   :  { %3309 = dma.done.wait [#allocation6], 1552  }
  0xbf   :  { %3310 = vsyncadd [#allocation6], 4294965744 }
  0xc0   :  { %3311 = dma.done.wait [#allocation9], 3088  }
  0xc1   :  { %3312 = vsyncadd [#allocation9], 4294964208 }
  0xc2   :  { %3313 = dma.done.wait [#allocation12], 3088  }
  0xc3   :  { %3314 = vsyncadd [#allocation12], 4294964208 }
  0xc4   :  { %3315 = dma.done.wait [#allocation15], 32  }
  0xc5   :  { %3316 = vsyncadd [#allocation15], 4294967264  ;;  %v186_v0 = vlaneseq  ;;  %v3330_v1 = vmov 0   ;;  %vm280_vm0 = vcmask 523264   ;;  %s4216_s8 = sld [smem:[#allocation24_spill]]  ;;  %v2999_v15 = vld [vmem:[#allocation5] sm:$0xff]  }
  0xc6   :  { %519 = vmatprep.subr.bf16.mxu1 %v3330_v1  ;;  %v3000_v21 = vld [vmem:[#allocation5 + $0x8] sm:$0xff]   ;;  %v3001_v31 = vld [vmem:[#allocation5 + $0x10] sm:$0xff]   ;;  %v3002_v38 = vld [vmem:[#allocation5 + $0x18] sm:$0xff]   ;;  %v3331_v53 = vmov 0.0|0.0   ;;  %vm3332_vm7 = vmmov 0   ;;  %vm590_vm8 = vcmask 1040384  }
  0xc7   :  { %v3584_v2 = vshrl.u32 %v186_v0, 7  ;;  %520 = vmatpush1.bf16.msra.mxu1 %v2999_v15  ;;  %v3011_v40 = vld [vmem:[#allocation2] sm:$0xff]   ;;  %v3012_v41 = vld [vmem:[#allocation2 + $0x8] sm:$0xff]   ;;  %v3013_v44 = vld [vmem:[#allocation2 + $0x10] sm:$0xff]   ;;  %vm716_vm9 = vcmask 64512   ;;  %vm3335_vm15 = vmmov 1  }
  0xc8   :  { %521 = vmatprep.subr.bf16.mxu1 %v3330_v1  ;;  %v3003_v42 = vld [vmem:[#allocation5 + $0x20] sm:$0xff]   ;;  %2661 = vmatprep.subr.bf16.mxu0 %v3011_v40  ;;  %v3004_v43 = vld [vmem:[#allocation5 + $0x28] sm:$0xff]   ;;  %v3014_v45 = vld [vmem:[#allocation2 + $0x18] sm:$0xff]   ;;  %s4233_s18 = sld [smem:[#allocation30_spill]]  ;;  %s4234_s27 = sld [smem:[#allocation26_spill]] }
  0xc9   :  { %v3587_v3 = vadd.s32 8, %v3584_v2  ;;  %vm4203_vm1 = vcmp.lt.s32.totalorder %v3584_v2, 7  ;;  %vm340_vm2 = vcmp.lt.s32.totalorder %v3584_v2, 1  ;;  %v3603_v7 = vadd.s32 24, %v3584_v2  ;;  %2662 = vmatpush3.bf16.msra.mxu0 %v3011_v40  ;;  %v3005_v46 = vld [vmem:[#allocation5 + $0x30] sm:$0xff]   ;;  %v592_v47 = vld [vmem:[%s4194_s19] sm:$0xff] }
  0xca   :  { %2663 = vmatprep.subr.bf16.mxu0 %v3012_v41  ;;  %v593_v48 = vld [vmem:[%s4194_s19 + $0x8] sm:$0xff]  ;;  %v3006_v49 = vld [vmem:[#allocation5 + $0x38] sm:$0xff]   ;;  %v3007_v52 = vld [vmem:[#allocation5 + $0x40] sm:$0xff]   ;;  %v195_v57 = vand.u32 15, %v3584_v2  ;;  %v3691_v58 = vadd.s32 16, %v3584_v2  ;;  %vm810_vm10 = vcmp.lt.s32.totalorder %v3584_v2, 2 }
  0xcb   :  { %v182_v4 = vld [vmem:[%s4216_s8] sm:$0xff]  ;;  %v183_v5 = vld [vmem:[%s4216_s8 + $0x8] sm:$0xff]  ;;  %v3598_v6 = vld [vmem:[%s4216_s8 + $0x10] sm:$0xff]  ;;  %v202_v16 = vand.u32 15, %v3587_v3  ;;  %v216_v27 = vand.u32 15, %v3603_v7  ;;  %522 = vmatpush1.bf16.msra.mxu1 %v3000_v21  ;;  %v3679_v51 = vpack.c.bf16 %v593_v48, %v592_v47  ;;  %vm835_vm11 = vcmp.lt.s32.totalorder %v3584_v2, 6 }
  0xcc   :  { %v337_v8 = vrot.slane %v183_v5, 7  ;;  %v2989_v9 = vpack.i.bf16 %v183_v5, %v182_v4  ;;  %v336_v10 = vrot.slane %v182_v4, 7  ;;  %v3608_v11 = vld [vmem:[%s4216_s8 + $0x18] sm:$0xff]  ;;  %v338_v12 = vrot.slane %v3598_v6, 7  ;;  %523 = vmatprep.subr.bf16.mxu1 %v3330_v1  ;;  %v3008_v54 = vld [vmem:[#allocation5 + $0x48] sm:$0xff]   ;;  %v3009_v55 = vld [vmem:[#allocation5 + $0x50] sm:$0xff]  }
  0xcd   :  { %v339_v13 = vrot.slane %v3608_v11, 7  ;;  %v364_v14 = vrot.slane %v3608_v11, 1  ;;  %v2994_v17 = vpack.i.bf16 %v3608_v11, %v3598_v6  ;;  %v239_v20 = vpack.c.bf16 %v183_v5, %v182_v4  ;;  %2664 = vmatpush3.bf16.msra.mxu0 %v3012_v41  ;;  %v3010_v56 = vld [vmem:[#allocation5 + $0x58] sm:$0xff]   ;;  %v594_v15 = vld [vmem:[%s4194_s19 + $0x10] sm:$0xff]  ;;  %v2365_v47 = vld [vmem:[#allocation7] ss:$0 sm:$0xff] }
  0xce   :  { %2990 = vrot.lane.b32.xlu0 %v2989_v9, %s3321_s1  ;;  %v3619_v18 = vsel %vm340_vm2, %v336_v10, %v337_v8  ;;  %v3623_v19 = vsel %vm340_vm2, %v337_v8, %v338_v12  ;;  %v361_v22 = vrot.slane %v182_v4, 1  ;;  %v362_v25 = vrot.slane %v183_v5, 1  ;;  %2665 = vmatprep.subr.bf16.mxu0 %v3013_v44  ;;  %v3059_v59 = vld [vmem:[#allocation13 + $0x50] sm:$0xff]  }
  0xcf   :  { %v3627_v23 = vsel %vm340_vm2, %v339_v13, %v336_v10  ;;  %v3631_v24 = vsel %vm340_vm2, %v338_v12, %v339_v13  ;;  %2669 = vmatprep.mubr.msk.bf16.mxu0 %vm280_vm0, %v239_v20  ;;  %v363_v26 = vrot.slane %v3598_v6, 1  ;;  %vm3644_vm3 = vcmp.lt.s32.totalorder %v202_v16, 15  ;;  %524 = vmatpush1.bf16.msra.mxu1 %v3001_v31  ;;  %v597_v20 = vld [vmem:[%s4194_s19 + $0x28] sm:$0xff]  ;;  %v603_v31 = vld [vmem:[%s4194_s19 + $0x58] sm:$0xff] }
  0xd0   :  { %v369_v28 = vsel %vm4203_vm1, %v364_v14, %v361_v22  ;;  %v368_v29 = vsel %vm4203_vm1, %v361_v22, %v362_v25  ;;  %vm3657_vm4 = vcmp.lt.s32.totalorder %v216_v27, 15  ;;  %525 = vmatprep.subr.bf16.mxu1 %v3330_v1  ;;  %v240_v50 = vpack.c.bf16 %v3608_v11, %v3598_v6  ;;  %v598_v22 = vld [vmem:[%s4194_s19 + $0x30] sm:$0xff] }
  0xd1   :  { %v367_v32 = vsel %vm4203_vm1, %v362_v25, %v363_v26  ;;  %v366_v33 = vsel %vm4203_vm1, %v363_v26, %v364_v14  ;;  %v385_v37 = vsel %vm3657_vm4, %v369_v28, 0.0  ;;  %2666 = vmatpush3.bf16.msra.mxu0 %v3013_v44  ;;  %vm3695_vm5 = vcmp.ge.s32.totalorder %v195_v57, 1  ;;  %v600_v25 = vld [vmem:[%s4194_s19 + $0x40] sm:$0xff]  ;;  %v601_v26 = vld [vmem:[%s4194_s19 + $0x48] sm:$0xff]  ;;  %v3060_v36 = vld [vmem:[#allocation13 + $0x10] sm:$0xff]  }
  0xd2   :  { %2995 = vrot.lane.b32.xlu0 %v2994_v17, %s3321_s1  ;;  %v383_v34 = vsel %vm3644_vm3, %v367_v32, 0.0  ;;  %v3664_v39 = vpack.c.bf16 %v385_v37, %v366_v33  ;;  %2667 = vmatprep.subr.bf16.mxu0 %v3014_v45  ;;  %v209_v60 = vand.u32 15, %v3691_v58  ;;  %v357_v62 = vsel %vm3695_vm5, %v3627_v23, 0.0  ;;  %v595_v17 = vld [vmem:[%s4194_s19 + $0x18] sm:$0xff]  ;;  %v604_v33 = vld [vmem:[%s4194_s19 + $0x60] sm:$0xff]  ;;  %v606_v37 = vld [vmem:[%s4194_s19 + $0x70] sm:$0xff] }
  0xd3   :  { %v407_v35 = vpack.c.bf16 %v383_v34, %v368_v29  ;;  %526 = vmatpush1.bf16.msra.mxu1 %v3002_v38  ;;  %v599_v23 = vld [vmem:[%s4194_s19 + $0x38] sm:$0xff]  ;;  %v3756_v28 = vpack.c.bf16 %v601_v26, %v600_v25  ;;  %v602_v29 = vld [vmem:[%s4194_s19 + $0x50] sm:$0xff]  ;;  %v605_v34 = vld [vmem:[%s4194_s19 + $0x68] sm:$0xff]  ;;  %vm815_vm12 = vcmp.ge.s32.totalorder %v195_v57, 2  ;;  %vm3860_vm13 = vcmp.lt.s32.totalorder %v202_v16, 14 }
  0xd4   :  { %527 = vmatprep.subr.bf16.mxu1 %v3330_v1  ;;  %vm3705_vm6 = vcmp.ge.s32.totalorder %v209_v60, 1  ;;  %v3766_v32 = vpack.c.bf16 %v603_v31, %v602_v29  ;;  %v607_v38 = vld [vmem:[%s4194_s19 + $0x78] sm:$0xff]  ;;  %vm3866_vm14 = vcmp.lt.s32.totalorder %v216_v27, 14  ;;  %vm2412_vm1 = vmpackc.low %vm3860_vm13, %vm3335_vm15  ;;  %vm817_vm13 = vcmp.ge.s32.totalorder %v209_v60, 2 }
  0xd5   :  { %2378 = vmatprep.mubr.msk.bf16.mxu1 %vm280_vm0, %v407_v35  ;;  %2668 = vmatpush3.bf16.msra.mxu0 %v3014_v45  ;;  %v359_v9 = vsel %vm3705_vm6, %v3623_v19, 0.0  ;;  %v596_v19 = vld [vmem:[%s4194_s19 + $0x20] sm:$0xff]  ;;  %v3776_v35 = vpack.c.bf16 %v605_v34, %v604_v33  ;;  %v3787_v40 = vpack.c.bf16 %v607_v38, %v606_v37 }
  0xd6   :  { %2873 = vmatprep.subr.bf16.mxu0 %v3331_v53  ;;  %v3736_v21 = vpack.c.bf16 %v597_v20, %v596_v19  ;;  %v3826_v37 = vld [vmem:[%s4195_s20] sm:$0xff] }
  0xd7   :  { %528 = vmatpush1.bf16.msra.mxu1 %v3003_v42  ;;  %v3015_v38 = vld [vmem:[#allocation8 + $0x40] sm:$0xff]  }
  0xd8   :  { %529 = vmatprep.subr.bf16.mxu1 %v3330_v1  ;;  %2670 = vmatmul.mubr.msk.bf16.vlgmr.msra.gmra.mrb[0].mxu0 %vm280_vm0, %v240_v50 }
  0xd9   :  { %2875 = vmatpush3.bf16.msra.mxu0 %v3679_v51 }
  0xda   :  { %2876 = vmatprep.subr.bf16.mxu0 %v3331_v53 }
  0xdb   :  { %530 = vmatpush1.bf16.msra.mxu1 %v3004_v43 }
  0xdc   :  { %531 = vmatprep.subr.bf16.mxu1 %v3330_v1 }
  0xdf   :  { %532 = vmatpush1.bf16.msra.mxu1 %v3005_v46 }
  0xe0   :  { %533 = vmatprep.subr.bf16.mxu1 %v3330_v1 }
  0xe3   :  { %534 = vmatpush1.bf16.msra.mxu1 %v3006_v49 }
  0xe4   :  { %535 = vmatprep.subr.bf16.mxu1 %v3330_v1 }
  0xe7   :  { %536 = vmatpush1.bf16.msra.mxu1 %v3007_v52 }
  0xe8   :  { %537 = vmatprep.subr.bf16.mxu1 %v3330_v1 }
  0xeb   :  { %538 = vmatpush1.bf16.msra.mxu1 %v3008_v54 }
  0xec   :  { %539 = vmatprep.subr.bf16.mxu1 %v3330_v1 }
  0xef   :  { %540 = vmatpush1.bf16.msra.mxu1 %v3009_v55 }
  0xf0   :  { %541 = vmatprep.subr.bf16.mxu1 %v3330_v1  ;;  %v3067_v1 = vld [vmem:[#allocation13 + $0x70] sm:$0xff]  }
  0xf3   :  { %542 = vmatpush1.bf16.msra.mxu1 %v3010_v56 }
  0xf4   :  { %2500 = vmatprep.subr.bf16.mxu1 %v3015_v38  ;;  %v3020_v38 = vld [vmem:[#allocation8 + $0x88] sm:$0xff]  }
 0x140   :  { %v2991_v61 = vpop.permute.xlu0 %2990 }
 0x141   :  { %v2993_v63 = vunpack.i.h.bf16 %v2991_v61  ;;  %v2992_v0 = vunpack.i.l.bf16 %v2991_v61 }
 0x143   :  { %v402_v4 = vsel %vm280_vm0, %v357_v62, %v2992_v0  ;;  %v403_v5 = vsel %vm280_vm0, %v3619_v18, %v2993_v63  ;;  %v3726_v18 = vpack.c.bf16 %v595_v17, %v594_v15 }
 0x144   :  { %v406_v6 = vpack.c.bf16 %v403_v5, %v402_v4  ;;  %v2996_v8 = vpop.permute.xlu0 %2995 }
 0x145   :  { %v2998_v10 = vunpack.i.h.bf16 %v2996_v8  ;;  %v2997_v11 = vunpack.i.l.bf16 %v2996_v8  ;;  %2878 = vmatpush3.bf16.msra.mxu0 %v3726_v18 }
 0x146   :  { %552 = vmatmul.mubr.bf16.vlgmr.msra.gmra.mrb[0].mxu1 %v406_v6  ;;  %2879 = vmatprep.subr.bf16.mxu0 %v3331_v53 }
 0x147   :  { %2379 = vmatprep.mubr.msk.bf16.mxu1 %vm280_vm0, %v3664_v39  ;;  %v404_v12 = vsel %vm280_vm0, %v359_v9, %v2997_v11  ;;  %v405_v13 = vsel %vm280_vm0, %v3631_v24, %v2998_v10  ;;  %v3746_v24 = vpack.c.bf16 %v599_v23, %v598_v22  ;;  %v3333_v39 = vmov 0.0   ;;  %vm2406_vm0 = vmpackc.low %vm3335_vm15, %vm815_vm12 }
 0x148   :  { %v408_v14 = vpack.c.bf16 %v405_v13, %v404_v12  ;;  %2705 = vmatprep.mubr.msk.f32.mxu0 %vm3332_vm7, %v3333_v39  ;;  %vm2415_vm12 = vmpackc.low %vm3866_vm14, %vm3335_vm15 }
 0x149   :  { %2881 = vmatpush3.bf16.msra.mxu0 %v3736_v21  ;;  %vm2436_vm14 = vmpackc.low %vm3644_vm3, %vm3335_vm15 }
 0x14a   :  { %2882 = vmatprep.subr.bf16.mxu0 %v3331_v53  ;;  %vm2445_vm3 = vmpackc.low %vm3335_vm15, %vm3705_vm6 }
 0x14d   :  { %2884 = vmatpush3.bf16.msra.mxu0 %v3746_v24 }
 0x14e   :  { %560 = vmatmul.mubr.bf16.gmra.mrb[4].mxu1 %v408_v14  ;;  %2885 = vmatprep.subr.bf16.mxu0 %v3331_v53 }
 0x151   :  { %2887 = vmatpush3.bf16.msra.mxu0 %v3756_v28 }
 0x152   :  { %2888 = vmatprep.subr.bf16.mxu0 %v3331_v53 }
 0x155   :  { %2890 = vmatpush3.bf16.msra.mxu0 %v3766_v32 }
 0x156   :  { %2891 = vmatprep.subr.bf16.mxu0 %v3331_v53 }
 0x159   :  { %2893 = vmatpush3.bf16.msra.mxu0 %v3776_v35 }
 0x15a   :  { %2894 = vmatprep.subr.bf16.mxu0 %v3331_v53 }
 0x15d   :  { %2896 = vmatpush3.bf16.msra.mxu0 %v3787_v40 }
 0x15e   :  { %2708 = vmatprep.subr.mxu0 %v3333_v39 }
 0x1ab   :  { %v3792_v41 = vpop.f32.mrb[0].mxu0 }
 0x1ac   :  { %v3794_v42 = vpop.f32.mrb[1].mxu0 }
 0x1ad   :  { %v3796_v43 = vpop.f32.mrb[2].mxu0 }
 0x1ae   :  { %v3798_v44 = vpop.f32.mrb[3].mxu0 }
 0x219   :  { %v553_v45 = vpop.f32.mrb[0].mxu1 }
 0x21a   :  { %v555_v46 = vpop.f32.mrb[1].mxu1  ;;  %v3802_v52 = vadd.f32 %v2365_v47, %v553_v45  ;;  %v3016_v45 = vld [vmem:[#allocation8] sm:$0xff]  }
 0x21b   :  { %v556_v48 = vpop.f32.mrb[2].mxu1  ;;  %v3017_v46 = vld [vmem:[#allocation8 + $0x80] sm:$0xff]   ;;  %2501 = vmatpush3.bf16.msra.mxu1 %v3016_v45 }
 0x21c   :  { %v3800_v49 = vadd.f32 %v2365_v47, %v556_v48  ;;  %v558_v50 = vpop.f32.mrb[3].mxu1  ;;  %v577_v56 = vmul.f32 %v3802_v52, %v3802_v52  ;;  %v3019_v48 = vld [vmem:[#allocation8 + $0x8] sm:$0xff]  }
 0x21d   :  { %v3021_v50 = vld [vmem:[#allocation8 + $0x50] sm:$0xff]  }
 0x21e   :  { %v578_v54 = vmul.f32 %v3800_v49, %v3800_v49  ;;  %v568_v61 = vadd.f32 %v3800_v49, %v3802_v52 }
 0x220   :  { %v581_v4 = vadd.f32 %v578_v54, %v577_v56  ;;  %v3022_v54 = vld [vmem:[#allocation8 + $0x10] sm:$0xff]   ;;  %v3025_v56 = vld [vmem:[#allocation8 + $0x18] sm:$0xff]  }
 0x221   :  { %v561_v55 = vpop.f32.mrb[4].mxu1 }
 0x222   :  { %v3810_v62 = vadd.f32 %v2365_v47, %v561_v55  ;;  %v563_v63 = vpop.f32.mrb[5].mxu1  ;;  %v3024_v55 = vld [vmem:[#allocation8 + $0x58] sm:$0xff]  }
 0x223   :  { %v564_v0 = vpop.f32.mrb[6].mxu1  ;;  %v3028_v63 = vld [vmem:[#allocation8 + $0x20] sm:$0xff]  }
 0x224   :  { %v569_v5 = vadd.f32 %v568_v61, %v3810_v62  ;;  %v579_v6 = vmul.f32 %v3810_v62, %v3810_v62  ;;  %v3815_v8 = vadd.f32 %v2365_v47, %v564_v0  ;;  %v566_v9 = vpop.f32.mrb[7].mxu1  ;;  %v3018_v47 = vld [vmem:[#allocation8 + $0x48] sm:$0xff]   ;;  %v3027_v61 = vld [vmem:[#allocation8 + $0x60] sm:$0xff]  }
 0x225   :  { %2502 = vmatprep.subr.bf16.mxu1 %v3018_v47  ;;  %v3023_v47 = vld [vmem:[#allocation8 + $0x90] sm:$0xff]  }
 0x226   :  { %v582_v10 = vadd.f32 %v581_v4, %v579_v6  ;;  %v570_v11 = vadd.f32 %v569_v5, %v3815_v8  ;;  %v580_v12 = vmul.f32 %v3815_v8, %v3815_v8  ;;  %2503 = vmatpush3.bf16.msra.mxu1 %v3019_v48  ;;  %v3026_v48 = vld [vmem:[#allocation8 + $0x98] sm:$0xff]  }
 0x227   :  { %2504 = vmatprep.subr.bf16.mxu1 %v3021_v50  ;;  %v3029_v50 = vld [vmem:[#allocation8 + $0xa0] sm:$0xff]  }
 0x228   :  { %v571_v13 = vrot.slane %v570_v11, 4  ;;  %v583_v14 = vadd.f32 %v582_v10, %v580_v12  ;;  %v3334_v12 = vmov 1966171168  }
 0x22a   :  { %v572_v15 = vadd.f32 %v571_v13, %v570_v11  ;;  %v584_v17 = vrot.slane %v583_v14, 4  ;;  %2505 = vmatpush3.bf16.msra.mxu1 %v3022_v54  ;;  %v689_v13 = vunpack.c.l.s4 %v3334_v12  ;;  %v3030_v54 = vld [vmem:[#allocation8 + $0x68] sm:$0xff]  }
 0x22b   :  { %2506 = vmatprep.subr.bf16.mxu1 %v3024_v55  ;;  %v3031_v55 = vld [vmem:[#allocation8 + $0x28] sm:$0xff]  }
 0x22c   :  { %v573_v19 = vrot.slane %v572_v15, 2  ;;  %v585_v20 = vadd.f32 %v584_v17, %v583_v14  ;;  %v690_v14 = vunpack.c.0.s8 %v689_v13 }
 0x22e   :  { %v574_v22 = vadd.f32 %v573_v19, %v572_v15  ;;  %v586_v23 = vrot.slane %v585_v20, 2  ;;  %2507 = vmatpush3.bf16.msra.mxu1 %v3025_v56  ;;  %v3830_v15 = vsub.s32 %v690_v14, %v3584_v2  ;;  %v3032_v56 = vld [vmem:[#allocation8 + $0xa8] sm:$0xff]  }
 0x22f   :  { %2508 = vmatprep.subr.bf16.mxu1 %v3027_v61  ;;  %v3033_v61 = vld [vmem:[#allocation8 + $0x70] sm:$0xff]  }
 0x230   :  { %v575_v25 = vrot.slane %v574_v22, 1  ;;  %v587_v26 = vadd.f32 %v586_v23, %v585_v20 }
 0x232   :  { %v588_v29 = vrot.slane %v587_v26, 1  ;;  %v576_v31 = vadd.f32 %v575_v25, %v574_v22  ;;  %2509 = vmatpush3.bf16.msra.mxu1 %v3028_v63  ;;  %v684_v22 = vld [vmem:[#allocation16] sm:$0x1]  ;;  %v3035_v63 = vld [vmem:[#allocation8 + $0xb0] sm:$0xff]  }
 0x233   :  { %2510 = vmatprep.subr.bf16.mxu1 %v3030_v54 }
 0x234   :  { %v589_v33 = vadd.f32 %v588_v29, %v587_v26  ;;  %v705_v26 = vld [vmem:[%s4187_s12] sm:$0x1] }
 0x236   :  { %v591_v34 = vsel %vm590_vm8, %v576_v31, %v589_v33  ;;  %v3838_v31 = vsub.s32 0, %v3584_v2  ;;  %2511 = vmatpush3.bf16.msra.mxu1 %v3031_v55 }
 0x237   :  { %2706 = vmatmul.mubr.f32.vlgmr.msra.gmra.mrb[4].mxu0 %v591_v34  ;;  %2512 = vmatprep.subr.bf16.mxu1 %v3033_v61 }
 0x238   :  { %2710 = vmatprep.mubr.msk.f32.mxu0 %vm3332_vm7, %v3333_v39  ;;  %2709 = vmatpush3.msra.mxu0 %v3826_v37 }
 0x239   :  { %2713 = vmatprep.subr.bf16.mxu0 %v3017_v46 }
 0x30a   :  { %v674_v0 = vpop.f32.mrb[4].mxu0 }
 0x30b   :  { %v678_v4 = vmul.f32 0.001953125, %v674_v0  ;;  %v2707_v5 = vpop.f32.mrb[5].mxu0  ;;  %v3036_v0 = vld [vmem:[#allocation8 + $0x78] sm:$0xff]  }
 0x30c   :  { %v3038_v5 = vld [vmem:[#allocation8 + $0xb8] sm:$0xff]  }
 0x30d   :  { %v679_v6 = vmul.f32 %v678_v4, %v678_v4 }
 0x30f   :  { %v681_v9 = vrot.slane %v679_v6, 7  ;;  %v3846_v6 = vsub.s32 1, %v3584_v2 }
 0x311   :  { %v683_v10 = vsub.f32 %v678_v4, %v681_v9 }
 0x313   :  { %v685_v11 = vadd.f32 1e-05, %v683_v10 }
 0x315   :  { %3079 = vrsqrt.f32 %v685_v11 }
 0x31f   :  { %v3080_v17 = vpop.eup %3079 }
 0x320   :  { %v694_v19 = vrot.slane %v3080_v17, %v3830_v15 }
 0x322   :  { %v695_v20 = vcombine.high %v694_v19, %v694_v19 }
 0x324   :  { %v702_v23 = vrot.slane %v695_v20, %v3830_v15 }
 0x326   :  { %v704_v25 = vmul.f32 %v702_v23, %v684_v22 }
 0x328   :  { %v706_v29 = vmul.f32 %v704_v25, %v678_v4  ;;  %v3037_v4 = vld [vmem:[#allocation8 + $0x38] sm:$0xff]  }
 0x32a   :  { %v707_v33 = vsub.f32 %v705_v26, %v706_v29 }
 0x32c   :  { %v712_v34 = vrot.slane %v707_v33, %v3838_v31 }
 0x32e   :  { %v714_v45 = vsel %vm590_vm8, %v704_v25, %v712_v34 }
 0x32f   :  { %2711 = vmatmul.mubr.msk.f32.vlgmr.msra.gmra.mrb[6].mxu0 %vm716_vm9, %v714_v45 }
 0x330   :  { %2714 = vmatpush3.bf16.msra.mxu0 %v3017_v46  ;;  %v3034_v46 = vld [vmem:[#allocation8 + $0x30] sm:$0xff]  }
 0x331   :  { %2715 = vmatprep.subr.bf16.mxu0 %v3020_v38  ;;  %2513 = vmatpush3.bf16.msra.mxu1 %v3034_v46 }
 0x332   :  { %2514 = vmatprep.subr.bf16.mxu1 %v3036_v0  ;;  %v2381_v0 = vld [vmem:[#allocation10] ss:$0 sm:$0xff] }
 0x334   :  { %2716 = vmatpush3.bf16.msra.mxu0 %v3020_v38 }
 0x335   :  { %2717 = vmatprep.subr.bf16.mxu0 %v3023_v47  ;;  %2515 = vmatpush3.bf16.msra.mxu1 %v3037_v4 }
 0x336   :  { %2897 = vmatprep.subr.bf16.mxu1 %v3331_v53 }
 0x338   :  { %2718 = vmatpush3.bf16.msra.mxu0 %v3023_v47 }
 0x339   :  { %2719 = vmatprep.subr.bf16.mxu0 %v3026_v48 }
 0x33c   :  { %2720 = vmatpush3.bf16.msra.mxu0 %v3026_v48 }
 0x33d   :  { %2721 = vmatprep.subr.bf16.mxu0 %v3029_v50 }
 0x340   :  { %2722 = vmatpush3.bf16.msra.mxu0 %v3029_v50 }
 0x341   :  { %2723 = vmatprep.subr.bf16.mxu0 %v3032_v56 }
 0x344   :  { %2724 = vmatpush3.bf16.msra.mxu0 %v3032_v56 }
 0x345   :  { %2725 = vmatprep.subr.bf16.mxu0 %v3035_v63 }
 0x348   :  { %2726 = vmatpush3.bf16.msra.mxu0 %v3035_v63 }
 0x349   :  { %2727 = vmatprep.subr.bf16.mxu0 %v3038_v5 }
 0x34c   :  { %2728 = vmatpush3.bf16.msra.mxu0 %v3038_v5 }
 0x34d   :  { %2768 = vmatprep.subr.mxu0 %v3333_v39 }
 0x402   :  { %v786_v9 = vpop.f32.mrb[6].mxu0 }
 0x403   :  { %v793_v10 = vrot.slane %v786_v9, %v3838_v31  ;;  %v2712_v11 = vpop.f32.mrb[7].mxu0  ;;  %v801_v12 = vrot.slane %v786_v9, %v3846_v6 }
 0x405   :  { %v794_v13 = vmul.f32 %v793_v10, %v3802_v52  ;;  %v795_v14 = vmul.f32 %v793_v10, %v3800_v49  ;;  %v796_v17 = vmul.f32 %v793_v10, %v3810_v62  ;;  %v797_v19 = vmul.f32 %v793_v10, %v3815_v8 }
 0x407   :  { %v804_v20 = vadd.f32 %v801_v12, %v796_v17  ;;  %v805_v22 = vadd.f32 %v801_v12, %v797_v19  ;;  %v802_v23 = vadd.f32 %v801_v12, %v794_v13  ;;  %v803_v25 = vadd.f32 %v801_v12, %v795_v14 }
 0x409   :  { %v809_v62 = vrot.slane %v805_v22, 6  ;;  %v834_v8 = vrot.slane %v805_v22, 2  ;;  %v806_v26 = vrot.slane %v802_v23, 6  ;;  %v807_v29 = vrot.slane %v803_v25, 6 }
 0x40a   :  { %v3870_v33 = vpack.c.bf16 %v803_v25, %v802_v23  ;;  %v831_v34 = vrot.slane %v802_v23, 2  ;;  %v832_v57 = vrot.slane %v803_v25, 2  ;;  %v833_v38 = vrot.slane %v804_v20, 2 }
 0x40b   :  { %v813_v3 = vsel %vm810_vm10, %v806_v26, %v807_v29  ;;  %v814_v16 = vsel %vm810_vm10, %v809_v62, %v806_v26  ;;  %v3887_v50 = vpack.c.bf16 %v805_v22, %v804_v20  ;;  %v808_v55 = vrot.slane %v804_v20, 6 }
 0x40c   :  { %1093 = vmatprep.mubr.bf16.mxu1 %v3870_v33  ;;  %v2407_v7 = vpack.c.bf16 %v813_v3, %v814_v16  ;;  %v837_v27 = vsel %vm835_vm11, %v832_v57, %v833_v38  ;;  %v838_v45 = vsel %vm835_vm11, %v831_v34, %v832_v57  ;;  %v836_v47 = vsel %vm835_vm11, %v833_v38, %v834_v8 }
 0x40d   :  { %v2413_v48 = vpack.c.bf16 %v837_v27, %v838_v45  ;;  %v839_v54 = vsel %vm835_vm11, %v834_v8, %v831_v34  ;;  %v811_v61 = vsel %vm810_vm10, %v808_v55, %v809_v62  ;;  %v812_v46 = vsel %vm810_vm10, %v807_v29, %v808_v55 }
 0x40e   :  { %2408 = vmatmul.mubr.msk.bf16.vlgmr.msra.gmra.mrb[8].mxu1 %vm2406_vm0, %v2407_v7  ;;  %v2416_v56 = vpack.c.bf16 %v839_v54, %v836_v47  ;;  %v2410_v63 = vpack.c.bf16 %v811_v61, %v812_v46  ;;  %vm4229_vm10 = vcmp.lt.s32.totalorder %v3584_v2, 7  ;;  %v3065_v2 = vld [vmem:[#allocation13 + $0x68] sm:$0xff]  }
 0x40f   :  { %2729 = vmatprep.mubr.msk.bf16.mxu0 %vm2412_vm1, %v2413_v48  ;;  %1101 = vmatprep.mubr.bf16.mxu1 %v3887_v50  ;;  %vm2409_vm1 = vmpackc.low %vm3335_vm15, %vm817_vm13 }
 0x410   :  { %2730 = vmatmul.mubr.msk.bf16.vlgmr.msra.gmra.mrb[8].mxu0 %vm2415_vm12, %v2416_v56  ;;  %2899 = vmatpush3.bf16.msra.mxu1 %v3679_v51  ;;  %vm4230_vm11 = vmmov %vm4229_vm10 }
 0x411   :  { %2900 = vmatprep.subr.bf16.mxu1 %v3331_v53  ;;  %2769 = vmatpush3.msra.mxu0 %v3826_v37  ;;  %vm4231_vm0 = vmmov %vm4229_vm10 }
 0x412   :  { %2770 = vmatprep.mubr.msk.f32.mxu0 %vm3332_vm7, %v3333_v39  ;;  %vm2439_vm12 = vmpackc.low %vm3335_vm15, %vm3695_vm5 }
 0x413   :  { %vm4232_vm13 = vmmov %vm4231_vm0 }
 0x414   :  { %2902 = vmatpush3.bf16.msra.mxu1 %v3726_v18 }
 0x415   :  { %2903 = vmatprep.subr.bf16.mxu1 %v3331_v53 }
 0x416   :  { %2411 = vmatmul.mubr.msk.bf16.gmra.mrb[12].mxu1 %vm2409_vm1, %v2410_v63  ;;  %vm2442_vm1 = vmpackc.low %vm3657_vm4, %vm3335_vm15 }
 0x417   :  { %2765 = vmatprep.mubr.msk.f32.mxu1 %vm3332_vm7, %v3333_v39 }
 0x418   :  { %2905 = vmatpush3.bf16.msra.mxu1 %v3736_v21 }
 0x419   :  { %2906 = vmatprep.subr.bf16.mxu1 %v3331_v53 }
 0x41c   :  { %2908 = vmatpush3.bf16.msra.mxu1 %v3746_v24 }
 0x41d   :  { %2909 = vmatprep.subr.bf16.mxu1 %v3331_v53 }
 0x420   :  { %2911 = vmatpush3.bf16.msra.mxu1 %v3756_v28 }
 0x421   :  { %2912 = vmatprep.subr.bf16.mxu1 %v3331_v53 }
 0x424   :  { %2914 = vmatpush3.bf16.msra.mxu1 %v3766_v32 }
 0x425   :  { %2915 = vmatprep.subr.bf16.mxu1 %v3331_v53 }
 0x428   :  { %2917 = vmatpush3.bf16.msra.mxu1 %v3776_v35 }
 0x429   :  { %2918 = vmatprep.subr.bf16.mxu1 %v3331_v53 }
 0x42c   :  { %2920 = vmatpush3.bf16.msra.mxu1 %v3787_v40 }
 0x42d   :  { %2921 = vmatprep.subr.bf16.mxu1 %v3331_v53 }
 0x4e1   :  { %v2516_v58 = vpop.f32.mrb[8].mxu1 }
 0x4e2   :  { %v2517_v60 = vpop.f32.mrb[9].mxu1 }
 0x4e3   :  { %v2518_v4 = vadd.f32 %v2517_v60, %v2516_v58  ;;  %v2731_v5 = vpop.f32.mrb[8].mxu0  ;;  %v2519_v9 = vpop.f32.mrb[10].mxu1 }
 0x4e4   :  { %v1144_v10 = vpop.f32.mrb[9].mxu0  ;;  %v2520_v11 = vpop.f32.mrb[11].mxu1 }
 0x4e5   :  { %v1096_v12 = vadd.f32 %v2518_v4, %v2381_v0  ;;  %v2521_v13 = vadd.f32 %v2520_v11, %v2519_v9  ;;  %v2732_v14 = vpop.f32.mrb[10].mxu0 }
 0x4e6   :  { %v1147_v17 = vpop.f32.mrb[11].mxu0 }
 0x4e7   :  { %v3923_v19 = vadd.f32 %v1144_v10, %v1096_v12  ;;  %v1099_v20 = vadd.f32 %v2521_v13, %v2381_v0  ;;  %v3039_v13 = vld [vmem:[%s4182_s7 + $0x40] sm:$0xff]  }
 0x4e8   :  { %2557 = vmatprep.subr.bf16.mxu0 %v3039_v13 }
 0x4e9   :  { %v3925_v22 = vadd.f32 %v1147_v17, %v1099_v20  ;;  %v2522_v23 = vpop.f32.mrb[12].mxu1  ;;  %v1168_v34 = vmul.f32 %v3923_v19, %v3923_v19 }
 0x4ea   :  { %v2523_v25 = vpop.f32.mrb[13].mxu1 }
 0x4eb   :  { %v2524_v52 = vadd.f32 %v2523_v25, %v2522_v23  ;;  %v2525_v49 = vpop.f32.mrb[14].mxu1  ;;  %v1169_v8 = vmul.f32 %v3925_v22, %v3925_v22  ;;  %v1159_v57 = vadd.f32 %v3925_v22, %v3923_v19 }
 0x4ec   :  { %v2526_v62 = vpop.f32.mrb[15].mxu1 }
 0x4ed   :  { %v1104_v26 = vadd.f32 %v2524_v52, %v2381_v0  ;;  %v2527_v29 = vadd.f32 %v2526_v62, %v2525_v49  ;;  %v1172_v16 = vadd.f32 %v1169_v8, %v1168_v34 }
 0x4ef   :  { %v3933_v38 = vadd.f32 %v2731_v5, %v1104_v26  ;;  %v1107_v3 = vadd.f32 %v2527_v29, %v2381_v0  ;;  %v1258_v29 = vld [vmem:[%s4188_s13] sm:$0x1] }
 0x4f1   :  { %v1160_v7 = vadd.f32 %v1159_v57, %v3933_v38  ;;  %v1170_v27 = vmul.f32 %v3933_v38, %v3933_v38  ;;  %v3938_v45 = vadd.f32 %v2732_v14, %v1107_v3  ;;  %v1279_v3 = vld [vmem:[%s4189_s14] sm:$0x1] }
 0x4f3   :  { %v1173_v47 = vadd.f32 %v1172_v16, %v1170_v27  ;;  %v1161_v48 = vadd.f32 %v1160_v7, %v3938_v45  ;;  %v1171_v54 = vmul.f32 %v3938_v45, %v3938_v45 }
 0x4f5   :  { %v1162_v55 = vrot.slane %v1161_v48, 4  ;;  %v1174_v56 = vadd.f32 %v1173_v47, %v1171_v54  ;;  %v3040_v47 = vld [vmem:[%s4182_s7] sm:$0xff]  }
 0x4f7   :  { %v1163_v61 = vadd.f32 %v1162_v55, %v1161_v48  ;;  %v1175_v46 = vrot.slane %v1174_v56, 4  ;;  %v3041_v48 = vld [vmem:[%s4182_s7 + $0x48] sm:$0xff]  }
 0x4f8   :  { %v3042_v55 = vld [vmem:[%s4182_s7 + $0x8] sm:$0xff]  }
 0x4f9   :  { %v1164_v63 = vrot.slane %v1163_v61, 2  ;;  %v1176_v58 = vadd.f32 %v1175_v46, %v1174_v56  ;;  %v3043_v56 = vld [vmem:[%s4182_s7 + $0x50] sm:$0xff]   ;;  %v3045_v46 = vld [vmem:[%s4182_s7 + $0x58] sm:$0xff]  }
 0x4fb   :  { %v1165_v60 = vadd.f32 %v1164_v63, %v1163_v61  ;;  %v1177_v0 = vrot.slane %v1176_v58, 2  ;;  %v3044_v61 = vld [vmem:[%s4182_s7 + $0x10] sm:$0xff]   ;;  %v3046_v63 = vld [vmem:[%s4182_s7 + $0x18] sm:$0xff]  }
 0x4fd   :  { %v1166_v4 = vrot.slane %v1165_v60, 1  ;;  %v1178_v5 = vadd.f32 %v1177_v0, %v1176_v58  ;;  %v3047_v58 = vld [vmem:[%s4182_s7 + $0x60] sm:$0xff]   ;;  %v3049_v0 = vld [vmem:[%s4182_s7 + $0x68] sm:$0xff]  }
 0x4ff   :  { %v1179_v9 = vrot.slane %v1178_v5, 1  ;;  %v1167_v10 = vadd.f32 %v1166_v4, %v1165_v60  ;;  %v3048_v60 = vld [vmem:[%s4182_s7 + $0x20] sm:$0xff]   ;;  %v3050_v4 = vld [vmem:[%s4182_s7 + $0x28] sm:$0xff]  }
 0x501   :  { %v1180_v11 = vadd.f32 %v1179_v9, %v1178_v5  ;;  %v3051_v5 = vld [vmem:[%s4182_s7 + $0x70] sm:$0xff]  }
 0x502   :  { %v3052_v9 = vld [vmem:[%s4182_s7 + $0x30] sm:$0xff]  }
 0x503   :  { %v1181_v12 = vsel %vm590_vm8, %v1167_v10, %v1180_v11  ;;  %v3053_v10 = vld [vmem:[%s4182_s7 + $0x78] sm:$0xff]  }
 0x504   :  { %2766 = vmatmul.mubr.f32.vlgmr.msra.gmra.mrb[16].mxu1 %v1181_v12  ;;  %v3054_v11 = vld [vmem:[%s4182_s7 + $0x38] sm:$0xff]   ;;  %v3055_v12 = vld [vmem:[#allocation13 + $0x40] sm:$0xff]  }
 0x505   :  { %2923 = vmatpush3.bf16.msra.mxu1 %v3679_v51  ;;  %2805 = vmatprep.mubr.msk.f32.mxu1 %vm3332_vm7, %v3333_v39 }
 0x506   :  { %2924 = vmatprep.subr.bf16.mxu1 %v3331_v53 }
 0x509   :  { %2926 = vmatpush3.bf16.msra.mxu1 %v3726_v18 }
 0x50a   :  { %2927 = vmatprep.subr.bf16.mxu1 %v3331_v53 }
 0x50d   :  { %2929 = vmatpush3.bf16.msra.mxu1 %v3736_v21 }
 0x50e   :  { %2930 = vmatprep.subr.bf16.mxu1 %v3331_v53 }
 0x511   :  { %2932 = vmatpush3.bf16.msra.mxu1 %v3746_v24 }
 0x512   :  { %2933 = vmatprep.subr.bf16.mxu1 %v3331_v53 }
 0x515   :  { %2935 = vmatpush3.bf16.msra.mxu1 %v3756_v28 }
 0x516   :  { %2936 = vmatprep.subr.bf16.mxu1 %v3331_v53 }
 0x519   :  { %2938 = vmatpush3.bf16.msra.mxu1 %v3766_v32 }
 0x51a   :  { %2939 = vmatprep.subr.bf16.mxu1 %v3331_v53 }
 0x51d   :  { %2941 = vmatpush3.bf16.msra.mxu1 %v3776_v35 }
 0x51e   :  { %2942 = vmatprep.subr.bf16.mxu1 %v3331_v53 }
 0x521   :  { %2944 = vmatpush3.bf16.msra.mxu1 %v3787_v40 }
 0x522   :  { %2808 = vmatprep.subr.mxu1 %v3333_v39 }
 0x5d7   :  { %v1248_v14 = vpop.f32.mrb[16].mxu1 }
 0x5d8   :  { %v1252_v17 = vmul.f32 0.001953125, %v1248_v14  ;;  %v2767_v20 = vpop.f32.mrb[17].mxu1 }
 0x5da   :  { %v1253_v23 = vmul.f32 %v1252_v17, %v1252_v17 }
 0x5dc   :  { %v1255_v25 = vrot.slane %v1253_v23, 7 }
 0x5de   :  { %v1257_v52 = vsub.f32 %v1252_v17, %v1255_v25 }
 0x5e0   :  { %v1259_v49 = vadd.f32 1e-05, %v1257_v52 }
 0x5e2   :  { %3081 = vrsqrt.f32 %v1259_v49 }
 0x5ec   :  { %v3082_v62 = vpop.eup %3081 }
 0x5ed   :  { %v1268_v8 = vrot.slane %v3082_v62, %v3830_v15 }
 0x5ef   :  { %v1269_v26 = vcombine.high %v1268_v8, %v1268_v8 }
 0x5f1   :  { %v1276_v34 = vrot.slane %v1269_v26, %v3830_v15 }
 0x5f3   :  { %v1278_v57 = vmul.f32 %v1276_v34, %v1258_v29 }
 0x5f5   :  { %v1280_v16 = vmul.f32 %v1278_v57, %v1252_v17 }
 0x5f7   :  { %v1281_v7 = vsub.f32 %v1279_v3, %v1280_v16 }
 0x5f9   :  { %v1286_v27 = vrot.slane %v1281_v7, %v3838_v31 }
 0x5fb   :  { %v1288_v54 = vsel %vm590_vm8, %v1278_v57, %v1286_v27 }
 0x5fc   :  { %2771 = vmatmul.mubr.msk.f32.vlgmr.msra.gmra.mrb[12].mxu0 %vm716_vm9, %v1288_v54 }
 0x5fd   :  { %2558 = vmatpush3.bf16.msra.mxu0 %v3040_v47 }
 0x5fe   :  { %2559 = vmatprep.subr.bf16.mxu0 %v3041_v48 }
 0x601   :  { %2560 = vmatpush3.bf16.msra.mxu0 %v3042_v55 }
 0x602   :  { %2561 = vmatprep.subr.bf16.mxu0 %v3043_v56  ;;  %v3056_v56 = vld [vmem:[#allocation13] sm:$0xff]  }
 0x605   :  { %2562 = vmatpush3.bf16.msra.mxu0 %v3044_v61 }
 0x606   :  { %2563 = vmatprep.subr.bf16.mxu0 %v3045_v46  ;;  %v3057_v46 = vld [vmem:[#allocation13 + $0x48] sm:$0xff]  }
 0x609   :  { %2564 = vmatpush3.bf16.msra.mxu0 %v3046_v63 }
 0x60a   :  { %2565 = vmatprep.subr.bf16.mxu0 %v3047_v58  ;;  %v3058_v58 = vld [vmem:[#allocation13 + $0x8] sm:$0xff]  }
 0x60d   :  { %2566 = vmatpush3.bf16.msra.mxu0 %v3048_v60 }
 0x60e   :  { %2567 = vmatprep.subr.bf16.mxu0 %v3049_v0 }
 0x611   :  { %2568 = vmatpush3.bf16.msra.mxu0 %v3050_v4 }
 0x612   :  { %2569 = vmatprep.subr.bf16.mxu0 %v3051_v5  ;;  %v3061_v5 = vld [vmem:[#allocation13 + $0x58] sm:$0xff]  }
 0x615   :  { %2570 = vmatpush3.bf16.msra.mxu0 %v3052_v9 }
 0x616   :  { %2571 = vmatprep.subr.bf16.mxu0 %v3053_v10  ;;  %v3062_v10 = vld [vmem:[#allocation13 + $0x18] sm:$0xff]  }
 0x619   :  { %2572 = vmatpush3.bf16.msra.mxu0 %v3054_v11  ;;  %v3063_v11 = vld [vmem:[#allocation13 + $0x60] sm:$0xff]  }
 0x61a   :  { %2604 = vmatprep.subr.bf16.mxu0 %v3055_v12  ;;  %v3064_v12 = vld [vmem:[#allocation13 + $0x20] sm:$0xff]  }
 0x6cf   :  { %v1358_v13 = vpop.f32.mrb[12].mxu0 }
 0x6d0   :  { %v1365_v14 = vrot.slane %v1358_v13, %v3838_v31  ;;  %v2772_v17 = vpop.f32.mrb[13].mxu0  ;;  %v1373_v20 = vrot.slane %v1358_v13, %v3846_v6  ;;  %v3066_v13 = vld [vmem:[#allocation13 + $0x28] sm:$0xff]  }
 0x6d1   :  { %v3069_v17 = vld [vmem:[#allocation13 + $0x78] sm:$0xff]  }
 0x6d2   :  { %v1366_v23 = vmul.f32 %v1365_v14, %v3923_v19  ;;  %v1367_v25 = vmul.f32 %v1365_v14, %v3925_v22  ;;  %v1368_v52 = vmul.f32 %v1365_v14, %v3933_v38  ;;  %v1369_v49 = vmul.f32 %v1365_v14, %v3938_v45  ;;  %v3068_v14 = vld [vmem:[#allocation13 + $0x30] sm:$0xff]  }
 0x6d4   :  { %v1374_v62 = vadd.f32 %v1373_v20, %v1366_v23  ;;  %v1375_v8 = vadd.f32 %v1373_v20, %v1367_v25  ;;  %v4027_v26 = vadd.f32 %v1373_v20, %v1368_v52  ;;  %v4029_v29 = vadd.f32 %v1373_v20, %v1369_v49  ;;  %v3070_v20 = vld [vmem:[#allocation13 + $0x38] sm:$0xff]  }
 0x6d5   :  { %v2419_v25 = vld [vmem:[#allocation11] ss:$0 sm:$0xff] }
 0x6d6   :  { %v1378_v34 = vrot.slane %v1374_v62, 7  ;;  %v1379_v57 = vrot.slane %v1375_v8, 7  ;;  %v1381_v3 = vrot.slane %v4029_v29, 7  ;;  %v1390_v16 = vrot.slane %v1374_v62, 1 }
 0x6d7   :  { %v1391_v7 = vrot.slane %v1375_v8, 1  ;;  %v1392_v19 = vrot.slane %v4027_v26, 1  ;;  %v1393_v22 = vrot.slane %v4029_v29, 1  ;;  %v1380_v63 = vrot.slane %v4027_v26, 7 }
 0x6d8   :  { %v1384_v38 = vsel %vm340_vm2, %v1378_v34, %v1379_v57  ;;  %v1385_v45 = vsel %vm340_vm2, %v1381_v3, %v1378_v34  ;;  %v1809_v9 = vpack.c.bf16 %v1375_v8, %v1374_v62  ;;  %v1811_v23 = vpack.c.bf16 %v4029_v29, %v4027_v26 }
 0x6d9   :  { %v1395_v27 = vsel %vm4229_vm10, %v1391_v7, %v1392_v19  ;;  %v1396_v47 = vsel %vm4230_vm11, %v1390_v16, %v1391_v7  ;;  %v2440_v48 = vpack.c.bf16 %v1384_v38, %v1385_v45  ;;  %v1394_v54 = vsel %vm4231_vm0, %v1392_v19, %v1393_v22 }
 0x6da   :  { %v2437_v55 = vpack.c.bf16 %v1395_v27, %v1396_v47  ;;  %v1397_v61 = vsel %vm4232_vm13, %v1393_v22, %v1390_v16  ;;  %v1382_v60 = vsel %vm340_vm2, %v1380_v63, %v1381_v3  ;;  %v1383_v0 = vsel %vm340_vm2, %v1379_v57, %v1380_v63 }
 0x6db   :  { %v2443_v30 = vpack.c.bf16 %v1397_v61, %v1394_v54  ;;  %v2446_v4 = vpack.c.bf16 %v1382_v60, %v1383_v0 }
 0x6dc   :  { %2438 = vmatprep.mubr.msk.bf16.mxu0 %vm2436_vm14, %v2437_v55 }
 0x6dd   :  { %2441 = vmatmul.mubr.msk.bf16.vlgmr.msra.gmra.mrb[16].mxu0 %vm2439_vm12, %v2440_v48 }
 0x6de   :  { %2605 = vmatpush3.bf16.msra.mxu0 %v3056_v56  ;;  %2444 = vmatprep.mubr.msk.bf16.mxu0 %vm2442_vm1, %v2443_v30 }
 0x6df   :  { %2606 = vmatprep.subr.bf16.mxu0 %v3057_v46 }
 0x6e2   :  { %2607 = vmatpush3.bf16.msra.mxu0 %v3058_v58 }
 0x6e3   :  { %2608 = vmatprep.subr.bf16.mxu0 %v3059_v59 }
 0x6e5   :  { %2447 = vmatmul.mubr.msk.bf16.gmra.mrb[20].mxu0 %vm2445_vm3, %v2446_v4 }
 0x6e6   :  { %2609 = vmatpush3.bf16.msra.mxu0 %v3060_v36  ;;  %2044 = vmatprep.mubr.bf16.mxu0 %v1809_v9 }
 0x6e7   :  { %2610 = vmatprep.subr.bf16.mxu0 %v3061_v5 }
 0x6ea   :  { %2611 = vmatpush3.bf16.msra.mxu0 %v3062_v10 }
 0x6eb   :  { %2612 = vmatprep.subr.bf16.mxu0 %v3063_v11 }
 0x6ee   :  { %2613 = vmatpush3.bf16.msra.mxu0 %v3064_v12 }
 0x6ef   :  { %2614 = vmatprep.subr.bf16.mxu0 %v3065_v2 }
 0x6f2   :  { %2615 = vmatpush3.bf16.msra.mxu0 %v3066_v13 }
 0x6f3   :  { %2616 = vmatprep.subr.bf16.mxu0 %v3067_v1 }
 0x6f6   :  { %2617 = vmatpush3.bf16.msra.mxu0 %v3068_v14 }
 0x6f7   :  { %2618 = vmatprep.subr.bf16.mxu0 %v3069_v17  ;;  %v3071_v17 = vld [vmem:[#allocation13 + $0x80] sm:$0xff]  }
 0x6fa   :  { %2619 = vmatpush3.bf16.msra.mxu0 %v3070_v20 }
 0x6fb   :  { %2945 = vmatprep.subr.bf16.mxu0 %v3331_v53 }
 0x6fd   :  { %2045 = vmatmul.mubr.bf16.vlgmr.msra.gmra.mrb[24].mxu0 %v3870_v33 }
 0x6fe   :  { %2052 = vmatprep.mubr.bf16.mxu0 %v1811_v23  ;;  %2947 = vmatpush3.bf16.msra.mxu0 %v3679_v51 }
 0x6ff   :  { %2948 = vmatprep.subr.bf16.mxu0 %v3331_v53 }
 0x702   :  { %2950 = vmatpush3.bf16.msra.mxu0 %v3726_v18 }
 0x703   :  { %2951 = vmatprep.subr.bf16.mxu0 %v3331_v53 }
 0x705   :  { %2053 = vmatmul.mubr.bf16.gmra.mrb[28].mxu0 %v3887_v50 }
 0x706   :  { %2953 = vmatpush3.bf16.msra.mxu0 %v3736_v21  ;;  %2865 = vmatprep.mubr.msk.f32.mxu0 %vm3332_vm7, %v3333_v39 }
 0x707   :  { %2954 = vmatprep.subr.bf16.mxu0 %v3331_v53 }
 0x70a   :  { %2956 = vmatpush3.bf16.msra.mxu0 %v3746_v24 }
 0x70b   :  { %2957 = vmatprep.subr.bf16.mxu0 %v3331_v53 }
 0x70e   :  { %2959 = vmatpush3.bf16.msra.mxu0 %v3756_v28 }
 0x70f   :  { %2960 = vmatprep.subr.bf16.mxu0 %v3331_v53 }
 0x712   :  { %2962 = vmatpush3.bf16.msra.mxu0 %v3766_v32 }
 0x713   :  { %2963 = vmatprep.subr.bf16.mxu0 %v3331_v53 }
 0x716   :  { %2965 = vmatpush3.bf16.msra.mxu0 %v3776_v35 }
 0x717   :  { %2966 = vmatprep.subr.bf16.mxu0 %v3331_v53 }
 0x71a   :  { %2968 = vmatpush3.bf16.msra.mxu0 %v3787_v40 }
 0x7b0   :  { %v2573_v51 = vpop.f32.mrb[16].mxu0 }
 0x7b1   :  { %v2574_v18 = vpop.f32.mrb[17].mxu0 }
 0x7b2   :  { %v2575_v21 = vadd.f32 %v2574_v18, %v2573_v51  ;;  %v2576_v24 = vpop.f32.mrb[18].mxu0 }
 0x7b3   :  { %v2577_v33 = vpop.f32.mrb[19].mxu0 }
 0x7b4   :  { %v2578_v50 = vadd.f32 %v2577_v33, %v2576_v24  ;;  %v4087_v52 = vadd.f32 %v2575_v21, %v2419_v25 }
 0x7b6   :  { %v4085_v28 = vadd.f32 %v2578_v50, %v2419_v25  ;;  %v1599_v40 = vmul.f32 %v4087_v52, %v4087_v52 }
 0x7b8   :  { %v2579_v32 = vpop.f32.mrb[20].mxu0  ;;  %v1600_v35 = vmul.f32 %v4085_v28, %v4085_v28  ;;  %v1590_v26 = vadd.f32 %v4085_v28, %v4087_v52 }
 0x7b9   :  { %v2580_v49 = vpop.f32.mrb[21].mxu0 }
 0x7ba   :  { %v2581_v62 = vadd.f32 %v2580_v49, %v2579_v32  ;;  %v2582_v53 = vpop.f32.mrb[22].mxu0  ;;  %v1603_v57 = vadd.f32 %v1600_v35, %v1599_v40  ;;  %v1689_v49 = vld [vmem:[%s4190_s15] sm:$0x1] }
 0x7bb   :  { %v2583_v8 = vpop.f32.mrb[23].mxu0 }
 0x7bc   :  { %v4095_v29 = vadd.f32 %v2581_v62, %v2419_v25  ;;  %v2584_v34 = vadd.f32 %v2583_v8, %v2582_v53  ;;  %v1710_v53 = vld [vmem:[%s4191_s16] sm:$0x1] }
 0x7be   :  { %v1591_v3 = vadd.f32 %v1590_v26, %v4095_v29  ;;  %v1601_v16 = vmul.f32 %v4095_v29, %v4095_v29  ;;  %v4100_v7 = vadd.f32 %v2584_v34, %v2419_v25  ;;  %v3072_v34 = vld [vmem:[#allocation13 + $0x88] sm:$0xff]  }
 0x7c0   :  { %v1604_v19 = vadd.f32 %v1603_v57, %v1601_v16  ;;  %v1592_v22 = vadd.f32 %v1591_v3, %v4100_v7  ;;  %v1602_v38 = vmul.f32 %v4100_v7, %v4100_v7  ;;  %v3073_v3 = vld [vmem:[#allocation13 + $0x90] sm:$0xff]   ;;  %v3074_v16 = vld [vmem:[#allocation13 + $0x98] sm:$0xff]  }
 0x7c2   :  { %v1593_v45 = vrot.slane %v1592_v22, 4  ;;  %v1605_v27 = vadd.f32 %v1604_v19, %v1602_v38  ;;  %v3075_v19 = vld [vmem:[#allocation13 + $0xa0] sm:$0xff]   ;;  %v3077_v38 = vld [vmem:[#allocation13 + $0xb0] sm:$0xff]  }
 0x7c4   :  { %v1594_v47 = vadd.f32 %v1593_v45, %v1592_v22  ;;  %v1606_v48 = vrot.slane %v1605_v27, 4  ;;  %v3076_v22 = vld [vmem:[#allocation13 + $0xa8] sm:$0xff]   ;;  %v3078_v45 = vld [vmem:[#allocation13 + $0xb8] sm:$0xff]  }
 0x7c6   :  { %v1595_v54 = vrot.slane %v1594_v47, 2  ;;  %v1607_v55 = vadd.f32 %v1606_v48, %v1605_v27 }
 0x7c8   :  { %v1596_v56 = vadd.f32 %v1595_v54, %v1594_v47  ;;  %v1608_v61 = vrot.slane %v1607_v55, 2 }
 0x7ca   :  { %v1597_v46 = vrot.slane %v1596_v56, 1  ;;  %v1609_v30 = vadd.f32 %v1608_v61, %v1607_v55 }
 0x7cc   :  { %v1610_v63 = vrot.slane %v1609_v30, 1  ;;  %v1598_v58 = vadd.f32 %v1597_v46, %v1596_v56 }
 0x7ce   :  { %v1611_v59 = vadd.f32 %v1610_v63, %v1609_v30 }
 0x7d0   :  { %v2620_v60 = vpop.f32.mrb[24].mxu0  ;;  %v1612_v0 = vsel %vm590_vm8, %v1598_v58, %v1611_v59 }
 0x7d1   :  { %v2621_v36 = vpop.f32.mrb[25].mxu0  ;;  %2806 = vmatmul.mubr.f32.vlgmr.msra.gmra.mrb[18].mxu1 %v1612_v0 }
 0x7d2   :  { %v4106_v4 = vadd.f32 %v2621_v36, %v2620_v60  ;;  %v2623_v5 = vpop.f32.mrb[26].mxu0  ;;  %2809 = vmatpush3.msra.mxu1 %v3826_v37  ;;  %2810 = vmatprep.mubr.msk.f32.mxu1 %vm3332_vm7, %v3333_v39 }
 0x7d3   :  { %v2624_v9 = vpop.f32.mrb[27].mxu0  ;;  %2813 = vmatprep.subr.bf16.mxu1 %v3071_v17 }
 0x7d4   :  { %v4111_v10 = vadd.f32 %v2624_v9, %v2623_v5 }
 0x7d8   :  { %v2626_v11 = vpop.f32.mrb[28].mxu0 }
 0x7d9   :  { %v2627_v12 = vpop.f32.mrb[29].mxu0 }
 0x7da   :  { %v4113_v2 = vadd.f32 %v2627_v12, %v2626_v11  ;;  %v2629_v13 = vpop.f32.mrb[30].mxu0 }
 0x7db   :  { %v2630_v1 = vpop.f32.mrb[31].mxu0 }
 0x7dc   :  { %v4115_v14 = vadd.f32 %v2630_v1, %v2629_v13 }
 0x8a4   :  { %v1679_v20 = vpop.f32.mrb[18].mxu1 }
 0x8a5   :  { %v1683_v23 = vmul.f32 0.001953125, %v1679_v20  ;;  %v2807_v51 = vpop.f32.mrb[19].mxu1 }
 0x8a7   :  { %v1684_v18 = vmul.f32 %v1683_v23, %v1683_v23 }
 0x8a9   :  { %v1686_v21 = vrot.slane %v1684_v18, 7 }
 0x8ab   :  { %v1688_v24 = vsub.f32 %v1683_v23, %v1686_v21 }
 0x8ad   :  { %v1690_v33 = vadd.f32 1e-05, %v1688_v24 }
 0x8af   :  { %3083 = vrsqrt.f32 %v1690_v33 }
 0x8b9   :  { %v3084_v50 = vpop.eup %3083 }
 0x8ba   :  { %v1699_v25 = vrot.slane %v3084_v50, %v3830_v15 }
 0x8bc   :  { %v1700_v32 = vcombine.high %v1699_v25, %v1699_v25 }
 0x8be   :  { %v1707_v35 = vrot.slane %v1700_v32, %v3830_v15 }
 0x8c0   :  { %v1709_v62 = vmul.f32 %v1707_v35, %v1689_v49 }
 0x8c2   :  { %v1711_v8 = vmul.f32 %v1709_v62, %v1683_v23 }
 0x8c4   :  { %v1712_v40 = vsub.f32 %v1710_v53, %v1711_v8 }
 0x8c6   :  { %v1717_v26 = vrot.slane %v1712_v40, %v3838_v31 }
 0x8c8   :  { %v1719_v57 = vsel %vm590_vm8, %v1709_v62, %v1717_v26 }
 0x8c9   :  { %2811 = vmatmul.mubr.msk.f32.vlgmr.msra.gmra.mrb[20].mxu1 %vm716_vm9, %v1719_v57 }
 0x8ca   :  { %2814 = vmatpush3.bf16.msra.mxu1 %v3071_v17 }
 0x8cb   :  { %2815 = vmatprep.subr.bf16.mxu1 %v3072_v34 }
 0x8ce   :  { %2816 = vmatpush3.bf16.msra.mxu1 %v3072_v34 }
 0x8cf   :  { %2817 = vmatprep.subr.bf16.mxu1 %v3073_v3 }
 0x8d2   :  { %2818 = vmatpush3.bf16.msra.mxu1 %v3073_v3 }
 0x8d3   :  { %2819 = vmatprep.subr.bf16.mxu1 %v3074_v16 }
 0x8d6   :  { %2820 = vmatpush3.bf16.msra.mxu1 %v3074_v16 }
 0x8d7   :  { %2821 = vmatprep.subr.bf16.mxu1 %v3075_v19 }
 0x8da   :  { %2822 = vmatpush3.bf16.msra.mxu1 %v3075_v19 }
 0x8db   :  { %2823 = vmatprep.subr.bf16.mxu1 %v3076_v22 }
 0x8de   :  { %2824 = vmatpush3.bf16.msra.mxu1 %v3076_v22 }
 0x8df   :  { %2825 = vmatprep.subr.bf16.mxu1 %v3077_v38 }
 0x8e2   :  { %2826 = vmatpush3.bf16.msra.mxu1 %v3077_v38 }
 0x8e3   :  { %2827 = vmatprep.subr.bf16.mxu1 %v3078_v45 }
 0x8e6   :  { %2828 = vmatpush3.bf16.msra.mxu1 %v3078_v45 }
 0x8e7   :  { %2868 = vmatprep.subr.mxu1 %v3333_v39 }
 0x99c   :  { %v1789_v27 = vpop.f32.mrb[20].mxu1 }
 0x99d   :  { %v1796_v47 = vrot.slane %v1789_v27, %v3838_v31  ;;  %v2812_v48 = vpop.f32.mrb[21].mxu1  ;;  %v1804_v54 = vrot.slane %v1789_v27, %v3846_v6 }
 0x99f   :  { %v1799_v55 = vmul.f32 %v1796_v47, %v4095_v29  ;;  %v1800_v56 = vmul.f32 %v1796_v47, %v4100_v7  ;;  %v1797_v61 = vmul.f32 %v1796_v47, %v4087_v52  ;;  %v1798_v46 = vmul.f32 %v1796_v47, %v4085_v28  ;;  %v2449_v29 = vld [vmem:[#allocation14] ss:$0 sm:$0xff] }
 0x9a0   :  { %v2055_v7 = vadd.f32 %v4113_v2, %v2449_v29  ;;  %v2047_v52 = vadd.f32 %v4106_v4, %v2449_v29  ;;  %v2058_v9 = vadd.f32 %v4115_v14, %v2449_v29  ;;  %v2050_v13 = vadd.f32 %v4111_v10, %v2449_v29 }
 0x9a1   :  { %v1805_v30 = vadd.f32 %v1804_v54, %v1797_v61  ;;  %v1806_v63 = vadd.f32 %v1804_v54, %v1798_v46  ;;  %v1807_v58 = vadd.f32 %v1804_v54, %v1799_v55  ;;  %v1808_v59 = vadd.f32 %v1804_v54, %v1800_v56  ;;  %v2209_v54 = vld [vmem:[%s4192_s17] sm:$0x1]  ;;  %s3336_s17 = smov [#allocation17]  }
 0x9a2   :  { %v2230_v61 = vld [vmem:[%s4233_s18] sm:$0x1]  ;;  %s2342_s21 = sshll.u32 %s3336_s17, 4  ;;  %s2343_s21 = int_to_ptr.vmem [resolvable:$true] %s2342_s21 }
 0x9a3   :  { %v1810_v60 = vpack.c.bf16 %v1806_v63, %v1805_v30  ;;  %v1812_v0 = vpack.c.bf16 %v1808_v59, %v1807_v58  ;;  %s3285_s5 = scalar_lea.vmem %s2343_s21, 512  ;;  %p3290_p3 = scmp.lt.s32.totalorder %s2343_s21, %s2343_s21 }
 0x9a4   :  { %p3286_p2 = scmp.ne.s32.totalorder %s2343_s21, %s3285_s5  ;;  %p3291_p4 = scmp.lt.s32.totalorder %s3285_s5, %s3285_s5 }
 0x9a5   :  { %2829 = vmatprep.mubr.bf16.mxu1 %v1810_v60  ;;  %v2358_v60 = vld [vmem:[%s4234_s27] ss:$0 sm:$0xff] }
 0x9a6   :  { %2830 = vmatmul.mubr.bf16.vlgmr.msra.gmra.mrb[24].mxu1 %v1812_v0  ;;  %p3292_p5 = por %p3291_p4, %p3290_p3 }
 0x9a7   :  { %2869 = vmatpush3.msra.mxu1 %v3826_v37  ;;  %2870 = vmatprep.mubr.msk.f32.mxu1 %vm3332_vm7, %v3333_v39 }
 0x9a8   :  { %p3293_p6 = pnand %p3292_p5, %p3286_p2 }
 0xa79   :  { %v2831_v36 = vpop.f32.mrb[24].mxu1 }
 0xa7a   :  { %v2104_v28 = vadd.f32 %v2831_v36, %v2055_v7  ;;  %v2095_v5 = vpop.f32.mrb[25].mxu1 }
 0xa7b   :  { %v2096_v11 = vadd.f32 %v2095_v5, %v2047_v52  ;;  %v2832_v12 = vpop.f32.mrb[26].mxu1 }
 0xa7c   :  { %v2107_v1 = vadd.f32 %v2832_v12, %v2058_v9  ;;  %v2098_v17 = vpop.f32.mrb[27].mxu1  ;;  %v2121_v51 = vmul.f32 %v2104_v28, %v2104_v28  ;;  %v330_v9 = vadd.f32 %v3792_v41, %v2358_v60  ;;  %v322_v12 = vadd.f32 %v2358_v60, %v3794_v42 }
 0xa7d   :  { %v2099_v37 = vadd.f32 %v2098_v17, %v2050_v13  ;;  %v2119_v20 = vmul.f32 %v2096_v11, %v2096_v11  ;;  %v333_v13 = vadd.f32 %v3796_v43, %v2358_v60  ;;  %v325_v17 = vadd.f32 %v2358_v60, %v3798_v44 }
 0xa7e   :  { %v2122_v21 = vmul.f32 %v2107_v1, %v2107_v1 }
 0xa7f   :  { %v2110_v23 = vadd.f32 %v2099_v37, %v2096_v11  ;;  %v2120_v39 = vmul.f32 %v2099_v37, %v2099_v37 }
 0xa81   :  { %v2111_v18 = vadd.f32 %v2110_v23, %v2104_v28  ;;  %v2123_v2 = vadd.f32 %v2120_v39, %v2119_v20 }
 0xa83   :  { %v2112_v24 = vadd.f32 %v2111_v18, %v2107_v1  ;;  %v2124_v4 = vadd.f32 %v2123_v2, %v2121_v51 }
 0xa85   :  { %v2113_v33 = vrot.slane %v2112_v24, 4  ;;  %v2125_v50 = vadd.f32 %v2124_v4, %v2122_v21 }
 0xa87   :  { %v2114_v25 = vadd.f32 %v2113_v33, %v2112_v24  ;;  %v2126_v14 = vrot.slane %v2125_v50, 4 }
 0xa89   :  { %v2115_v32 = vrot.slane %v2114_v25, 2  ;;  %v2127_v49 = vadd.f32 %v2126_v14, %v2125_v50 }
 0xa8b   :  { %v2116_v35 = vadd.f32 %v2115_v32, %v2114_v25  ;;  %v2128_v10 = vrot.slane %v2127_v49, 2 }
 0xa8d   :  { %v2117_v62 = vrot.slane %v2116_v35, 1  ;;  %v2129_v53 = vadd.f32 %v2128_v10, %v2127_v49 }
 0xa8f   :  { %v2130_v8 = vrot.slane %v2129_v53, 1  ;;  %v2118_v40 = vadd.f32 %v2117_v62, %v2116_v35 }
 0xa91   :  { %v2131_v26 = vadd.f32 %v2130_v8, %v2129_v53 }
 0xa93   :  { %v2132_v34 = vsel %vm590_vm8, %v2118_v40, %v2131_v26 }
 0xa94   :  { %2866 = vmatmul.mubr.f32.vlgmr.msra.gmra.mrb[14].mxu0 %v2132_v34 }
 0xb67   :  { %v2199_v57 = vpop.f32.mrb[14].mxu0 }
 0xb68   :  { %v2203_v3 = vmul.f32 0.001953125, %v2199_v57  ;;  %v2867_v16 = vpop.f32.mrb[15].mxu0 }
 0xb6a   :  { %v2204_v19 = vmul.f32 %v2203_v3, %v2203_v3 }
 0xb6c   :  { %v2206_v22 = vrot.slane %v2204_v19, 7 }
 0xb6e   :  { %v2208_v38 = vsub.f32 %v2203_v3, %v2206_v22 }
 0xb70   :  { %v2210_v45 = vadd.f32 1e-05, %v2208_v38 }
 0xb72   :  { %3085 = vrsqrt.f32 %v2210_v45 }
 0xb7c   :  { %v3086_v27 = vpop.eup %3085 }
 0xb7d   :  { %v2219_v47 = vrot.slane %v3086_v27, %v3830_v15 }
 0xb7f   :  { %v2220_v48 = vcombine.high %v2219_v47, %v2219_v47 }
 0xb81   :  { %v2227_v55 = vrot.slane %v2220_v48, %v3830_v15 }
 0xb83   :  { %v2229_v56 = vmul.f32 %v2227_v55, %v2209_v54 }
 0xb85   :  { %v2231_v46 = vmul.f32 %v2229_v56, %v2203_v3 }
 0xb87   :  { %v2232_v30 = vsub.f32 %v2230_v61, %v2231_v46 }
 0xb89   :  { %v2237_v63 = vrot.slane %v2232_v30, %v3838_v31 }
 0xb8b   :  { %v2239_v58 = vsel %vm590_vm8, %v2229_v56, %v2237_v63 }
 0xb8c   :  { %2871 = vmatmul.mubr.msk.f32.vlgmr.msra.gmra.mrb[22].mxu1 %vm716_vm9, %v2239_v58 }
 0xc5f   :  { %v2309_v59 = vpop.f32.mrb[22].mxu1 }
 0xc60   :  { %v2316_v15 = vrot.slane %v2309_v59, %v3838_v31  ;;  %v2872_v0 = vpop.f32.mrb[23].mxu1  ;;  %v2324_v29 = vrot.slane %v2309_v59, %v3846_v6 }
 0xc62   :  { %v2317_v7 = vmul.f32 %v2316_v15, %v2096_v11  ;;  %v2318_v36 = vmul.f32 %v2316_v15, %v2099_v37  ;;  %v2319_v52 = vmul.f32 %v2316_v15, %v2104_v28  ;;  %v2320_v5 = vmul.f32 %v2316_v15, %v2107_v1 }
 0xc64   :  { %v2325_v20 = vadd.f32 %v2324_v29, %v2317_v7  ;;  %v2326_v23 = vadd.f32 %v2324_v29, %v2318_v36  ;;  %v2327_v31 = vadd.f32 %v2324_v29, %v2319_v52  ;;  %v2328_v39 = vadd.f32 %v2324_v29, %v2320_v5 }
 0xc66   :  { %v2329_v51 = vadd.f32 %v2325_v20, %v322_v12  ;;  %v2330_v6 = vadd.f32 %v2326_v23, %v325_v17  ;;  %v2331_v11 = vadd.f32 %v2327_v31, %v330_v9  ;;  %v2332_v37 = vadd.f32 %v2328_v39, %v333_v13 }
 0xc68   :  { %2333 = vst [vmem:[#allocation17] sm:$0xff] %v2329_v51  ;;  %2334 = vst [vmem:[#allocation17 + $0x8] sm:$0xff] %v2330_v6 }
 0xc69   :  { %2335 = vst [vmem:[#allocation17 + $0x10] sm:$0xff] %v2331_v11  ;;  %2336 = vst [vmem:[#allocation17 + $0x18] sm:$0xff] %v2332_v37 }
 0xc6a   :  { %3296 = shalt.err (!%p3293_p6)
}
 0xc6b   :  { %s4235_s22 = sld [smem:[#allocation31_spill]] }
 0xc71   :  { %s3297_s19 = scalar_lea.hbm %s4235_s22, 512 }
 0xc72   :  { %p3298_p7 = scmp.ne.s32.totalorder %s4235_s22, %s3297_s19  ;;  %p3301_p8 = scmp.lt.u32.totalorder %s3297_s19, %s4235_s22 }
 0xc74   :  { %p3303_p9 = pnand %p3301_p8, %p3298_p7 }
 0xc76   :  { %3306 = shalt.err (!%p3303_p9)
}
 0xc77   :  { %s3337_s23 = smov 128   ;;  %s3338_s11 = smov 8  }
 0xc78   :  { %2348 = dma.vmem_to_hbm [thread:$0]  %s2343_s21, 512, %s4235_s22, [#allocation4], %s3337_s23, %s3337_s23, %s3338_s11  }
 0xc79   :  { %3317 = dma.done.wait [#allocation4], 512  }
 0xc7a   :  { %3318 = vsyncadd [#allocation4], 4294966784 }
 0xc7b   :  { %2352 = vsyncpa [#allocation3], 1 }
 0xc7c   :  { %2353 = vsyncpa [#allocation6], 1 }
 0xc7d   :  { %2354 = vsyncpa [#allocation9], 1 }
 0xc7e   :  { %2355 = vsyncpa [#allocation12], 1 }
 0xc7f   :  { %2356 = vsyncpa [#allocation15], 1 }
 0xc80   :  { %2357 = vsyncpa [#allocation4], 1 }

</bundles_post_ra>
